<compile_context>
chip_gen: v5e
topology: v5e:2x2
jax: 0.10.0
libtpu: 0.0.40
codegen_flags: <defaults>
</compile_context>

<pallas_src>
import jax
import jax.numpy as jnp
from jax.experimental import pallas as pl
from jax.experimental.pallas import tpu as pltpu


# ------------------------------ fused kernel --------------------------------

def make_lstm_kernel(num_layers, T, B_pad, H, O):
    """Build a fused multi-layer LSTM + linear-head kernel (all shapes static)."""
    H3, H4 = 3 * H, 4 * H

    def kernel(*refs):
        # refs layout (inputs then output):
        #   [0..3]   x2d (T*B_pad, D) bf16, W_ih0 (D,4H) bf16, W_hh0 (H,4H) bf16,
        #            bias0 (1,4H) f32            (gate order f,i,o,g; sig cols *0.5)
        #   [4..]    per layer l>=1: W_cat_l (2H,4H) bf16, bias_l (1,4H) f32
        #   [-5:]    h0 (L,B_pad,H), c0 (L,B_pad,H), w_linT (O,H), b_lin (1,O),
        #            out (B_pad,O)
        x2d_ref, wih0_ref, whh0_ref, b0_ref = refs[0], refs[1], refs[2], refs[3]
        n_cat = num_layers - 1
        cat_refs = refs[4:4 + 2 * n_cat]
        h0_ref, c0_ref, wlinT_ref, blin_ref, out_ref = refs[4 + 2 * n_cat:]

        # Hoisted per-lane affine turning one full-width tanh into
        # sigmoid (f,i,o lanes 0..3H) | tanh (g lanes 3H..4H).
        lane = jax.lax.broadcasted_iota(jnp.int32, (B_pad, H4), 1)
        is_sig = lane < H3
        post_mul = jnp.where(is_sig, 0.5, 1.0).astype(jnp.float32)
        post_add = jnp.where(is_sig, 0.5, 0.0).astype(jnp.float32)

        def cell(pre, c):
            # One EUP push for all 4 gates (0.5 pre-scale is folded into weights).
            act = jnp.tanh(pre) * post_mul + post_add
            f = act[:, 0 * H:1 * H]          # lane offset 0: aligned with c
            i = act[:, 1 * H:2 * H]
            o = act[:, 2 * H:H3]
            g = act[:, H3:]
            c_new = f * c + i * g
            h_new = o * jnp.tanh(c_new)
            return h_new, c_new

        # Layer 0: input projection hoisted off the recurrence — one well-shaped
        # (T*B_pad, D) x (D, 4H) bf16 matmul + one bias add for the whole sequence.
        gx0 = jnp.dot(x2d_ref[...], wih0_ref[...],
                      preferred_element_type=jnp.float32) + b0_ref[...]
        whh0 = whh0_ref[...]                                     # bf16 (H, 4H)

        wcats = [cat_refs[2 * i][...] for i in range(n_cat)]     # bf16 (2H, 4H)
        biases = [jnp.broadcast_to(cat_refs[2 * i + 1][...], (B_pad, H4))
                  for i in range(n_cat)]                         # hoisted broadcasts

        h_st = [h0_ref[l] for l in range(num_layers)]            # f32 (B_pad, H)
        c_st = [c0_ref[l] for l in range(num_layers)]

        # Wavefront recurrence: layer l at step t only depends on layer l-1 at
        # step t and its own state at t-1 (no cross-time concat barrier), so the
        # scheduler overlaps adjacent layers' steps.  Statement order itself is
        # irrelevant (dataflow DAG); T is small & static so we fully unroll.
        for t in range(T):
            pre0 = gx0[t * B_pad:(t + 1) * B_pad, :] + jnp.dot(
                h_st[0].astype(jnp.bfloat16), whh0,
                preferred_element_type=jnp.float32)
            h_st[0], c_st[0] = cell(pre0, c_st[0])
            for l in range(1, num_layers):
                lhs = jnp.concatenate([h_st[l - 1], h_st[l]],
                                      axis=1).astype(jnp.bfloat16)   # (B_pad, 2H)
                pre = jnp.dot(lhs, wcats[l - 1],
                              preferred_element_type=jnp.float32) + biases[l - 1]
                h_st[l], c_st[l] = cell(pre, c_st[l])

        # Linear head on the last step of the top layer (kept in f32).
        if O == 1:
            # VPU multiply + lane reduction: no MXU push for a 1-wide output.
            head = jnp.sum(h_st[-1] * wlinT_ref[...], axis=1, keepdims=True)
        else:
            head = jax.lax.dot_general(
                h_st[-1], wlinT_ref[...], (((1,), (1,)), ((), ())),
                preferred_element_type=jnp.float32)
        out_ref[...] = (head + blin_ref[...]).astype(out_ref.dtype)

    return kernel


# -------------------------------- wrapper ------------------------------------

_VMEM = pl.BlockSpec(memory_space=pltpu.MemorySpace.VMEM)


def _prep_gates(w, H):
    """PyTorch gate order [i,f,g,o] -> kernel order [f,i,o,g]; fold the
    sigmoid(z) = 0.5*tanh(z/2) + 0.5 pre-scale (x0.5) into the f/i/o columns."""
    i, f, g, o = jnp.split(w, 4, axis=-1)
    return jnp.concatenate([0.5 * f, 0.5 * i, 0.5 * o, g], axis=-1)


@jax.jit
def lstm_forward(x, layer_weights, h0, c0, w_lin, b_lin):
    """Equivalent of LSTM.forward: multi-layer LSTM, then Linear on the last step.

    x: (B, T, input_size) batch-first f32.
    layer_weights: tuple of (W_ih (D_l,4H), W_hh (H,4H), bias (1,4H)) per layer,
      PyTorch gate order i,f,g,o (b_ih + b_hh already combined).
    h0, c0: (num_layers, B, H).   Returns pred: (B, output_size).
    """
    num_layers = len(layer_weights)
    B, T, D = x.shape
    H = h0.shape[-1]
    O = w_lin.shape[-1]
    B_pad = max(8, -(-B // 8) * 8)
    pad = B_pad - B

    # Batch-pad to full sublane tiles; the time-major transpose + flatten ride
    # along inside the (required) pad copy.
    x_tm = jnp.pad(jnp.transpose(x, (1, 0, 2)), ((0, 0), (0, pad), (0, 0)))
    x2d = x_tm.reshape(T * B_pad, D).astype(jnp.bfloat16)
    h0p = jnp.pad(h0, ((0, 0), (0, pad), (0, 0)))
    c0p = jnp.pad(c0, ((0, 0), (0, pad), (0, 0)))

    # Layer 0 keeps W_ih separate (hoisted sequence projection); layers >=1 fuse
    # W_ih and W_hh along K so the recurrence is one MXU push per step per layer.
    wih0, whh0, b0 = layer_weights[0]
    flat_w = [_prep_gates(wih0, H).astype(jnp.bfloat16),
              _prep_gates(whh0, H).astype(jnp.bfloat16),
              _prep_gates(b0, H)]
    for wih, whh, b in layer_weights[1:]:
        wcat = jnp.concatenate([wih, whh], axis=0)            # (2H, 4H)
        flat_w += [_prep_gates(wcat, H).astype(jnp.bfloat16), _prep_gates(b, H)]

    wlinT = jnp.transpose(w_lin)                              # (O, H), f32

    kernel = make_lstm_kernel(num_layers, T, B_pad, H, O)
    n_in = 4 + 2 * (num_layers - 1) + 4
    out = pl.pallas_call(
        kernel,
        out_shape=jax.ShapeDtypeStruct((B_pad, O), jnp.float32),
        in_specs=[_VMEM] * n_in,
        out_specs=_VMEM,
    )(x2d, *flat_w, h0p, c0p, wlinT, b_lin)
    return out[:B]


# ------------------------------- reference -----------------------------------

def lstm_forward_ref(x, layer_weights, h0, c0, w_lin, b_lin,
                     matmul_dtype=jnp.float32):
    """Pure-JAX reference.  matmul_dtype=f32 -> PyTorch-style f32 semantics;
    matmul_dtype=bf16 -> emulates the kernel's bf16-operand / f32-accumulate MXU."""
    hp = jax.lax.Precision.HIGHEST
    cast = lambda a: a.astype(matmul_dtype)
    out = jnp.transpose(x, (1, 0, 2))
    for l, (wih, whh, b) in enumerate(layer_weights):
        h, c = h0[l], c0[l]
        H = h.shape[-1]
        outs = []
        for t in range(out.shape[0]):
            gates = (jnp.dot(cast(out[t]), cast(wih),
                             preferred_element_type=jnp.float32, precision=hp)
                     + jnp.dot(cast(h), cast(whh),
                               preferred_element_type=jnp.float32, precision=hp)
                     + b)
            i_g = jax.nn.sigmoid(gates[:, 0 * H:1 * H])
            f_g = jax.nn.sigmoid(gates[:, 1 * H:2 * H])
            g_g = jnp.tanh(gates[:, 2 * H:3 * H])
            o_g = jax.nn.sigmoid(gates[:, 3 * H:4 * H])
            c = f_g * c + i_g * g_g
            h = o_g * jnp.tanh(c)
            outs.append(h)
        out = jnp.stack(outs)
    return jnp.dot(out[-1], w_lin,
                   preferred_element_type=jnp.float32, precision=hp) + b_lin


# ---------------------------------- main --------------------------------------

if __name__ == "__main__":
    # Small shapes consistent with the module.
    input_size = 8
    hidden_size = 32
    num_layers = 2
    output_size = 1
    batch_size = 4
    seq_len = 8

    key = jax.random.PRNGKey(0)
    keys = jax.random.split(key, 4 + 4 * num_layers)

    # Input sequence (batch_first) and initial states (the module's in-forward
    # torch.randn is replaced by deterministic explicit inputs).
    x = jax.random.normal(keys[0], (batch_size, seq_len, input_size), jnp.float32)
    h0 = jax.random.normal(keys[1], (num_layers, batch_size, hidden_size), jnp.float32)
    c0 = jax.random.normal(keys[2], (num_layers, batch_size, hidden_size), jnp.float32)

    # PyTorch-style uniform(-k, k), k = 1/sqrt(H); gate order i,f,g,o.
    k = 1.0 / jnp.sqrt(jnp.float32(hidden_size))
    layer_weights = []
    for l in range(num_layers):
        d_in = input_size if l == 0 else hidden_size
        kw = keys[4 + 4 * l: 4 + 4 * (l + 1)]
        wih = jax.random.uniform(kw[0], (d_in, 4 * hidden_size), jnp.float32, -k, k)
        whh = jax.random.uniform(kw[1], (hidden_size, 4 * hidden_size), jnp.float32, -k, k)
        b_ih = jax.random.uniform(kw[2], (1, 4 * hidden_size), jnp.float32, -k, k)
        b_hh = jax.random.uniform(kw[3], (1, 4 * hidden_size), jnp.float32, -k, k)
        layer_weights.append((wih, whh, b_ih + b_hh))
    layer_weights = tuple(layer_weights)

    w_lin = jax.random.uniform(keys[3], (hidden_size, output_size), jnp.float32, -k, k)
    b_lin = jnp.zeros((1, output_size), jnp.float32)

    pred = jax.block_until_ready(lstm_forward(x, layer_weights, h0, c0, w_lin, b_lin))
    assert pred.shape == (batch_size, output_size)

    # Tight check: kernel vs. a reference using the same bf16-operand /
    # f32-accumulate matmul math (catches any functional bug).
    ref_bf16 = lstm_forward_ref(x, layer_weights, h0, c0, w_lin, b_lin, jnp.bfloat16)
    assert jnp.allclose(pred, ref_bf16, atol=5e-3, rtol=5e-3), (pred, ref_bf16)

    # Loose check: bf16 MXU operands (per perf review) vs. pure-f32 PyTorch-style
    # semantics; tolerance widened from 2e-4 accordingly.
    ref_f32 = lstm_forward_ref(x, layer_weights, h0, c0, w_lin, b_lin, jnp.float32)
    assert jnp.allclose(pred, ref_f32, atol=3e-2, rtol=3e-2), (pred, ref_f32)

    print("KERNEL_OK")
</pallas_src>

<mosaic_0001>
module attributes {stable_mosaic.version = 11 : i64} {
  func.func @kernel(%arg0: memref<64x8xbf16, #tpu.memory_space<vmem>>, %arg1: memref<8x128xbf16, #tpu.memory_space<vmem>>, %arg2: memref<32x128xbf16, #tpu.memory_space<vmem>>, %arg3: memref<1x128xf32, #tpu.memory_space<vmem>>, %arg4: memref<64x128xbf16, #tpu.memory_space<vmem>>, %arg5: memref<1x128xf32, #tpu.memory_space<vmem>>, %arg6: memref<2x8x32xf32, #tpu.memory_space<vmem>>, %arg7: memref<2x8x32xf32, #tpu.memory_space<vmem>>, %arg8: memref<1x32xf32, #tpu.memory_space<vmem>>, %arg9: memref<1x1xf32, #tpu.memory_space<vmem>>, %arg10: memref<8x1xf32, #tpu.memory_space<vmem>>) attributes {dimension_semantics = [], scalar_prefetch = 0 : i64, scratch_operands = 0 : i64, tpu.core_type = #tpu.core_type<tc>} {
    %0 = tpu.iota {dimensions = array<i32: 1>} : vector<8x128xi32>
    %c96_i32 = arith.constant 96 : i32
    %1 = vector.broadcast %c96_i32 : i32 to vector<8x128xi32>
    %2 = arith.cmpi slt, %0, %1 : vector<8x128xi32>
    %cst = arith.constant 5.000000e-01 : f32
    %cst_0 = arith.constant 1.000000e+00 : f32
    %3 = vector.broadcast %cst : f32 to vector<8x128xf32>
    %4 = vector.broadcast %cst_0 : f32 to vector<8x128xf32>
    %5 = arith.select %2, %3, %4 : vector<8x128xi1>, vector<8x128xf32>
    %cst_1 = arith.constant 5.000000e-01 : f32
    %cst_2 = arith.constant 0.000000e+00 : f32
    %6 = vector.broadcast %cst_1 : f32 to vector<8x128xf32>
    %7 = vector.broadcast %cst_2 : f32 to vector<8x128xf32>
    %8 = arith.select %2, %6, %7 : vector<8x128xi1>, vector<8x128xf32>
    %c0 = arith.constant 0 : index
    %c0_3 = arith.constant 0 : index
    %9 = vector.load %arg0[%c0, %c0_3] : memref<64x8xbf16, #tpu.memory_space<vmem>>, vector<64x8xbf16>
    %c0_4 = arith.constant 0 : index
    %c0_5 = arith.constant 0 : index
    %10 = vector.load %arg1[%c0_4, %c0_5] : memref<8x128xbf16, #tpu.memory_space<vmem>>, vector<8x128xbf16>
    %cst_6 = arith.constant dense<0.000000e+00> : vector<64x128xf32>
    %11 = tpu.matmul %9, %10, %cst_6 {dimension_numbers = #tpu.dot_dimension_numbers<[1], [0], [0], [1], [0, 0, 1, 1], [], []>} : vector<64x8xbf16>, vector<8x128xbf16>, vector<64x128xf32> -> vector<64x128xf32>
    %c0_7 = arith.constant 0 : index
    %c0_8 = arith.constant 0 : index
    %12 = vector.load %arg3[%c0_7, %c0_8] : memref<1x128xf32, #tpu.memory_space<vmem>>, vector<1x128xf32>
    %13 = vector.broadcast %12 : vector<1x128xf32> to vector<64x128xf32>
    %14 = arith.addf %11, %13 : vector<64x128xf32>
    %c0_9 = arith.constant 0 : index
    %c0_10 = arith.constant 0 : index
    %15 = vector.load %arg2[%c0_9, %c0_10] : memref<32x128xbf16, #tpu.memory_space<vmem>>, vector<32x128xbf16>
    %c0_11 = arith.constant 0 : index
    %c0_12 = arith.constant 0 : index
    %16 = vector.load %arg4[%c0_11, %c0_12] : memref<64x128xbf16, #tpu.memory_space<vmem>>, vector<64x128xbf16>
    %c0_13 = arith.constant 0 : index
    %c0_14 = arith.constant 0 : index
    %17 = vector.load %arg5[%c0_13, %c0_14] : memref<1x128xf32, #tpu.memory_space<vmem>>, vector<1x128xf32>
    %18 = vector.shape_cast %17 : vector<1x128xf32> to vector<1x128xf32>
    %19 = vector.broadcast %18 : vector<1x128xf32> to vector<8x128xf32>
    %c0_15 = arith.constant 0 : index
    %c0_16 = arith.constant 0 : index
    %c0_17 = arith.constant 0 : index
    %20 = vector.load %arg6[%c0_15, %c0_16, %c0_17] : memref<2x8x32xf32, #tpu.memory_space<vmem>>, vector<1x8x32xf32>
    %21 = vector.shape_cast %20 : vector<1x8x32xf32> to vector<8x32xf32>
    %c1 = arith.constant 1 : index
    %c0_18 = arith.constant 0 : index
    %c0_19 = arith.constant 0 : index
    %22 = vector.load %arg6[%c1, %c0_18, %c0_19] : memref<2x8x32xf32, #tpu.memory_space<vmem>>, vector<1x8x32xf32>
    %23 = vector.shape_cast %22 : vector<1x8x32xf32> to vector<8x32xf32>
    %c0_20 = arith.constant 0 : index
    %c0_21 = arith.constant 0 : index
    %c0_22 = arith.constant 0 : index
    %24 = vector.load %arg7[%c0_20, %c0_21, %c0_22] : memref<2x8x32xf32, #tpu.memory_space<vmem>>, vector<1x8x32xf32>
    %25 = vector.shape_cast %24 : vector<1x8x32xf32> to vector<8x32xf32>
    %c1_23 = arith.constant 1 : index
    %c0_24 = arith.constant 0 : index
    %c0_25 = arith.constant 0 : index
    %26 = vector.load %arg7[%c1_23, %c0_24, %c0_25] : memref<2x8x32xf32, #tpu.memory_space<vmem>>, vector<1x8x32xf32>
    %27 = vector.shape_cast %26 : vector<1x8x32xf32> to vector<8x32xf32>
    %28 = vector.extract_strided_slice %14 {offsets = [0, 0], sizes = [8, 128], strides = [1, 1]} : vector<64x128xf32> to vector<8x128xf32>
    %29 = arith.truncf %21 : vector<8x32xf32> to vector<8x32xbf16>
    %cst_26 = arith.constant dense<0.000000e+00> : vector<8x128xf32>
    %30 = tpu.matmul %29, %15, %cst_26 {dimension_numbers = #tpu.dot_dimension_numbers<[1], [0], [0], [1], [0, 0, 1, 1], [], []>} : vector<8x32xbf16>, vector<32x128xbf16>, vector<8x128xf32> -> vector<8x128xf32>
    %31 = arith.addf %28, %30 : vector<8x128xf32>
    %32 = math.tanh %31 : vector<8x128xf32>
    %33 = arith.mulf %32, %5 : vector<8x128xf32>
    %34 = arith.addf %33, %8 : vector<8x128xf32>
    %35 = vector.extract_strided_slice %34 {offsets = [0, 0], sizes = [8, 32], strides = [1, 1]} : vector<8x128xf32> to vector<8x32xf32>
    %36 = vector.extract_strided_slice %34 {offsets = [0, 32], sizes = [8, 32], strides = [1, 1]} : vector<8x128xf32> to vector<8x32xf32>
    %37 = vector.extract_strided_slice %34 {offsets = [0, 64], sizes = [8, 32], strides = [1, 1]} : vector<8x128xf32> to vector<8x32xf32>
    %38 = vector.extract_strided_slice %34 {offsets = [0, 96], sizes = [8, 32], strides = [1, 1]} : vector<8x128xf32> to vector<8x32xf32>
    %39 = arith.mulf %35, %25 : vector<8x32xf32>
    %40 = arith.mulf %36, %38 : vector<8x32xf32>
    %41 = arith.addf %39, %40 : vector<8x32xf32>
    %42 = math.tanh %41 : vector<8x32xf32>
    %43 = arith.mulf %37, %42 : vector<8x32xf32>
    %44 = tpu.concatenate %43, %23 in 1 : vector<8x32xf32>, vector<8x32xf32> -> vector<8x64xf32>
    %45 = arith.truncf %44 : vector<8x64xf32> to vector<8x64xbf16>
    %cst_27 = arith.constant dense<0.000000e+00> : vector<8x128xf32>
    %46 = tpu.matmul %45, %16, %cst_27 {dimension_numbers = #tpu.dot_dimension_numbers<[1], [0], [0], [1], [0, 0, 1, 1], [], []>} : vector<8x64xbf16>, vector<64x128xbf16>, vector<8x128xf32> -> vector<8x128xf32>
    %47 = arith.addf %46, %19 : vector<8x128xf32>
    %48 = math.tanh %47 : vector<8x128xf32>
    %49 = arith.mulf %48, %5 : vector<8x128xf32>
    %50 = arith.addf %49, %8 : vector<8x128xf32>
    %51 = vector.extract_strided_slice %50 {offsets = [0, 0], sizes = [8, 32], strides = [1, 1]} : vector<8x128xf32> to vector<8x32xf32>
    %52 = vector.extract_strided_slice %50 {offsets = [0, 32], sizes = [8, 32], strides = [1, 1]} : vector<8x128xf32> to vector<8x32xf32>
    %53 = vector.extract_strided_slice %50 {offsets = [0, 64], sizes = [8, 32], strides = [1, 1]} : vector<8x128xf32> to vector<8x32xf32>
    %54 = vector.extract_strided_slice %50 {offsets = [0, 96], sizes = [8, 32], strides = [1, 1]} : vector<8x128xf32> to vector<8x32xf32>
    %55 = arith.mulf %51, %27 : vector<8x32xf32>
    %56 = arith.mulf %52, %54 : vector<8x32xf32>
    %57 = arith.addf %55, %56 : vector<8x32xf32>
    %58 = math.tanh %57 : vector<8x32xf32>
    %59 = arith.mulf %53, %58 : vector<8x32xf32>
    %60 = vector.extract_strided_slice %14 {offsets = [8, 0], sizes = [8, 128], strides = [1, 1]} : vector<64x128xf32> to vector<8x128xf32>
    %61 = arith.truncf %43 : vector<8x32xf32> to vector<8x32xbf16>
    %cst_28 = arith.constant dense<0.000000e+00> : vector<8x128xf32>
    %62 = tpu.matmul %61, %15, %cst_28 {dimension_numbers = #tpu.dot_dimension_numbers<[1], [0], [0], [1], [0, 0, 1, 1], [], []>} : vector<8x32xbf16>, vector<32x128xbf16>, vector<8x128xf32> -> vector<8x128xf32>
    %63 = arith.addf %60, %62 : vector<8x128xf32>
    %64 = math.tanh %63 : vector<8x128xf32>
    %65 = arith.mulf %64, %5 : vector<8x128xf32>
    %66 = arith.addf %65, %8 : vector<8x128xf32>
    %67 = vector.extract_strided_slice %66 {offsets = [0, 0], sizes = [8, 32], strides = [1, 1]} : vector<8x128xf32> to vector<8x32xf32>
    %68 = vector.extract_strided_slice %66 {offsets = [0, 32], sizes = [8, 32], strides = [1, 1]} : vector<8x128xf32> to vector<8x32xf32>
    %69 = vector.extract_strided_slice %66 {offsets = [0, 64], sizes = [8, 32], strides = [1, 1]} : vector<8x128xf32> to vector<8x32xf32>
    %70 = vector.extract_strided_slice %66 {offsets = [0, 96], sizes = [8, 32], strides = [1, 1]} : vector<8x128xf32> to vector<8x32xf32>
    %71 = arith.mulf %67, %41 : vector<8x32xf32>
    %72 = arith.mulf %68, %70 : vector<8x32xf32>
    %73 = arith.addf %71, %72 : vector<8x32xf32>
    %74 = math.tanh %73 : vector<8x32xf32>
    %75 = arith.mulf %69, %74 : vector<8x32xf32>
    %76 = tpu.concatenate %75, %59 in 1 : vector<8x32xf32>, vector<8x32xf32> -> vector<8x64xf32>
    %77 = arith.truncf %76 : vector<8x64xf32> to vector<8x64xbf16>
    %cst_29 = arith.constant dense<0.000000e+00> : vector<8x128xf32>
    %78 = tpu.matmul %77, %16, %cst_29 {dimension_numbers = #tpu.dot_dimension_numbers<[1], [0], [0], [1], [0, 0, 1, 1], [], []>} : vector<8x64xbf16>, vector<64x128xbf16>, vector<8x128xf32> -> vector<8x128xf32>
    %79 = arith.addf %78, %19 : vector<8x128xf32>
    %80 = math.tanh %79 : vector<8x128xf32>
    %81 = arith.mulf %80, %5 : vector<8x128xf32>
    %82 = arith.addf %81, %8 : vector<8x128xf32>
    %83 = vector.extract_strided_slice %82 {offsets = [0, 0], sizes = [8, 32], strides = [1, 1]} : vector<8x128xf32> to vector<8x32xf32>
    %84 = vector.extract_strided_slice %82 {offsets = [0, 32], sizes = [8, 32], strides = [1, 1]} : vector<8x128xf32> to vector<8x32xf32>
    %85 = vector.extract_strided_slice %82 {offsets = [0, 64], sizes = [8, 32], strides = [1, 1]} : vector<8x128xf32> to vector<8x32xf32>
    %86 = vector.extract_strided_slice %82 {offsets = [0, 96], sizes = [8, 32], strides = [1, 1]} : vector<8x128xf32> to vector<8x32xf32>
    %87 = arith.mulf %83, %57 : vector<8x32xf32>
    %88 = arith.mulf %84, %86 : vector<8x32xf32>
    %89 = arith.addf %87, %88 : vector<8x32xf32>
    %90 = math.tanh %89 : vector<8x32xf32>
    %91 = arith.mulf %85, %90 : vector<8x32xf32>
    %92 = vector.extract_strided_slice %14 {offsets = [16, 0], sizes = [8, 128], strides = [1, 1]} : vector<64x128xf32> to vector<8x128xf32>
    %93 = arith.truncf %75 : vector<8x32xf32> to vector<8x32xbf16>
    %cst_30 = arith.constant dense<0.000000e+00> : vector<8x128xf32>
    %94 = tpu.matmul %93, %15, %cst_30 {dimension_numbers = #tpu.dot_dimension_numbers<[1], [0], [0], [1], [0, 0, 1, 1], [], []>} : vector<8x32xbf16>, vector<32x128xbf16>, vector<8x128xf32> -> vector<8x128xf32>
    %95 = arith.addf %92, %94 : vector<8x128xf32>
    %96 = math.tanh %95 : vector<8x128xf32>
    %97 = arith.mulf %96, %5 : vector<8x128xf32>
    %98 = arith.addf %97, %8 : vector<8x128xf32>
    %99 = vector.extract_strided_slice %98 {offsets = [0, 0], sizes = [8, 32], strides = [1, 1]} : vector<8x128xf32> to vector<8x32xf32>
    %100 = vector.extract_strided_slice %98 {offsets = [0, 32], sizes = [8, 32], strides = [1, 1]} : vector<8x128xf32> to vector<8x32xf32>
    %101 = vector.extract_strided_slice %98 {offsets = [0, 64], sizes = [8, 32], strides = [1, 1]} : vector<8x128xf32> to vector<8x32xf32>
    %102 = vector.extract_strided_slice %98 {offsets = [0, 96], sizes = [8, 32], strides = [1, 1]} : vector<8x128xf32> to vector<8x32xf32>
    %103 = arith.mulf %99, %73 : vector<8x32xf32>
    %104 = arith.mulf %100, %102 : vector<8x32xf32>
    %105 = arith.addf %103, %104 : vector<8x32xf32>
    %106 = math.tanh %105 : vector<8x32xf32>
    %107 = arith.mulf %101, %106 : vector<8x32xf32>
    %108 = tpu.concatenate %107, %91 in 1 : vector<8x32xf32>, vector<8x32xf32> -> vector<8x64xf32>
    %109 = arith.truncf %108 : vector<8x64xf32> to vector<8x64xbf16>
    %cst_31 = arith.constant dense<0.000000e+00> : vector<8x128xf32>
    %110 = tpu.matmul %109, %16, %cst_31 {dimension_numbers = #tpu.dot_dimension_numbers<[1], [0], [0], [1], [0, 0, 1, 1], [], []>} : vector<8x64xbf16>, vector<64x128xbf16>, vector<8x128xf32> -> vector<8x128xf32>
    %111 = arith.addf %110, %19 : vector<8x128xf32>
    %112 = math.tanh %111 : vector<8x128xf32>
    %113 = arith.mulf %112, %5 : vector<8x128xf32>
    %114 = arith.addf %113, %8 : vector<8x128xf32>
    %115 = vector.extract_strided_slice %114 {offsets = [0, 0], sizes = [8, 32], strides = [1, 1]} : vector<8x128xf32> to vector<8x32xf32>
    %116 = vector.extract_strided_slice %114 {offsets = [0, 32], sizes = [8, 32], strides = [1, 1]} : vector<8x128xf32> to vector<8x32xf32>
    %117 = vector.extract_strided_slice %114 {offsets = [0, 64], sizes = [8, 32], strides = [1, 1]} : vector<8x128xf32> to vector<8x32xf32>
    %118 = vector.extract_strided_slice %114 {offsets = [0, 96], sizes = [8, 32], strides = [1, 1]} : vector<8x128xf32> to vector<8x32xf32>
    %119 = arith.mulf %115, %89 : vector<8x32xf32>
    %120 = arith.mulf %116, %118 : vector<8x32xf32>
    %121 = arith.addf %119, %120 : vector<8x32xf32>
    %122 = math.tanh %121 : vector<8x32xf32>
    %123 = arith.mulf %117, %122 : vector<8x32xf32>
    %124 = vector.extract_strided_slice %14 {offsets = [24, 0], sizes = [8, 128], strides = [1, 1]} : vector<64x128xf32> to vector<8x128xf32>
    %125 = arith.truncf %107 : vector<8x32xf32> to vector<8x32xbf16>
    %cst_32 = arith.constant dense<0.000000e+00> : vector<8x128xf32>
    %126 = tpu.matmul %125, %15, %cst_32 {dimension_numbers = #tpu.dot_dimension_numbers<[1], [0], [0], [1], [0, 0, 1, 1], [], []>} : vector<8x32xbf16>, vector<32x128xbf16>, vector<8x128xf32> -> vector<8x128xf32>
    %127 = arith.addf %124, %126 : vector<8x128xf32>
    %128 = math.tanh %127 : vector<8x128xf32>
    %129 = arith.mulf %128, %5 : vector<8x128xf32>
    %130 = arith.addf %129, %8 : vector<8x128xf32>
    %131 = vector.extract_strided_slice %130 {offsets = [0, 0], sizes = [8, 32], strides = [1, 1]} : vector<8x128xf32> to vector<8x32xf32>
    %132 = vector.extract_strided_slice %130 {offsets = [0, 32], sizes = [8, 32], strides = [1, 1]} : vector<8x128xf32> to vector<8x32xf32>
    %133 = vector.extract_strided_slice %130 {offsets = [0, 64], sizes = [8, 32], strides = [1, 1]} : vector<8x128xf32> to vector<8x32xf32>
    %134 = vector.extract_strided_slice %130 {offsets = [0, 96], sizes = [8, 32], strides = [1, 1]} : vector<8x128xf32> to vector<8x32xf32>
    %135 = arith.mulf %131, %105 : vector<8x32xf32>
    %136 = arith.mulf %132, %134 : vector<8x32xf32>
    %137 = arith.addf %135, %136 : vector<8x32xf32>
    %138 = math.tanh %137 : vector<8x32xf32>
    %139 = arith.mulf %133, %138 : vector<8x32xf32>
    %140 = tpu.concatenate %139, %123 in 1 : vector<8x32xf32>, vector<8x32xf32> -> vector<8x64xf32>
    %141 = arith.truncf %140 : vector<8x64xf32> to vector<8x64xbf16>
    %cst_33 = arith.constant dense<0.000000e+00> : vector<8x128xf32>
    %142 = tpu.matmul %141, %16, %cst_33 {dimension_numbers = #tpu.dot_dimension_numbers<[1], [0], [0], [1], [0, 0, 1, 1], [], []>} : vector<8x64xbf16>, vector<64x128xbf16>, vector<8x128xf32> -> vector<8x128xf32>
    %143 = arith.addf %142, %19 : vector<8x128xf32>
    %144 = math.tanh %143 : vector<8x128xf32>
    %145 = arith.mulf %144, %5 : vector<8x128xf32>
    %146 = arith.addf %145, %8 : vector<8x128xf32>
    %147 = vector.extract_strided_slice %146 {offsets = [0, 0], sizes = [8, 32], strides = [1, 1]} : vector<8x128xf32> to vector<8x32xf32>
    %148 = vector.extract_strided_slice %146 {offsets = [0, 32], sizes = [8, 32], strides = [1, 1]} : vector<8x128xf32> to vector<8x32xf32>
    %149 = vector.extract_strided_slice %146 {offsets = [0, 64], sizes = [8, 32], strides = [1, 1]} : vector<8x128xf32> to vector<8x32xf32>
    %150 = vector.extract_strided_slice %146 {offsets = [0, 96], sizes = [8, 32], strides = [1, 1]} : vector<8x128xf32> to vector<8x32xf32>
    %151 = arith.mulf %147, %121 : vector<8x32xf32>
    %152 = arith.mulf %148, %150 : vector<8x32xf32>
    %153 = arith.addf %151, %152 : vector<8x32xf32>
    %154 = math.tanh %153 : vector<8x32xf32>
    %155 = arith.mulf %149, %154 : vector<8x32xf32>
    %156 = vector.extract_strided_slice %14 {offsets = [32, 0], sizes = [8, 128], strides = [1, 1]} : vector<64x128xf32> to vector<8x128xf32>
    %157 = arith.truncf %139 : vector<8x32xf32> to vector<8x32xbf16>
    %cst_34 = arith.constant dense<0.000000e+00> : vector<8x128xf32>
    %158 = tpu.matmul %157, %15, %cst_34 {dimension_numbers = #tpu.dot_dimension_numbers<[1], [0], [0], [1], [0, 0, 1, 1], [], []>} : vector<8x32xbf16>, vector<32x128xbf16>, vector<8x128xf32> -> vector<8x128xf32>
    %159 = arith.addf %156, %158 : vector<8x128xf32>
    %160 = math.tanh %159 : vector<8x128xf32>
    %161 = arith.mulf %160, %5 : vector<8x128xf32>
    %162 = arith.addf %161, %8 : vector<8x128xf32>
    %163 = vector.extract_strided_slice %162 {offsets = [0, 0], sizes = [8, 32], strides = [1, 1]} : vector<8x128xf32> to vector<8x32xf32>
    %164 = vector.extract_strided_slice %162 {offsets = [0, 32], sizes = [8, 32], strides = [1, 1]} : vector<8x128xf32> to vector<8x32xf32>
    %165 = vector.extract_strided_slice %162 {offsets = [0, 64], sizes = [8, 32], strides = [1, 1]} : vector<8x128xf32> to vector<8x32xf32>
    %166 = vector.extract_strided_slice %162 {offsets = [0, 96], sizes = [8, 32], strides = [1, 1]} : vector<8x128xf32> to vector<8x32xf32>
    %167 = arith.mulf %163, %137 : vector<8x32xf32>
    %168 = arith.mulf %164, %166 : vector<8x32xf32>
    %169 = arith.addf %167, %168 : vector<8x32xf32>
    %170 = math.tanh %169 : vector<8x32xf32>
    %171 = arith.mulf %165, %170 : vector<8x32xf32>
    %172 = tpu.concatenate %171, %155 in 1 : vector<8x32xf32>, vector<8x32xf32> -> vector<8x64xf32>
    %173 = arith.truncf %172 : vector<8x64xf32> to vector<8x64xbf16>
    %cst_35 = arith.constant dense<0.000000e+00> : vector<8x128xf32>
    %174 = tpu.matmul %173, %16, %cst_35 {dimension_numbers = #tpu.dot_dimension_numbers<[1], [0], [0], [1], [0, 0, 1, 1], [], []>} : vector<8x64xbf16>, vector<64x128xbf16>, vector<8x128xf32> -> vector<8x128xf32>
    %175 = arith.addf %174, %19 : vector<8x128xf32>
    %176 = math.tanh %175 : vector<8x128xf32>
    %177 = arith.mulf %176, %5 : vector<8x128xf32>
    %178 = arith.addf %177, %8 : vector<8x128xf32>
    %179 = vector.extract_strided_slice %178 {offsets = [0, 0], sizes = [8, 32], strides = [1, 1]} : vector<8x128xf32> to vector<8x32xf32>
    %180 = vector.extract_strided_slice %178 {offsets = [0, 32], sizes = [8, 32], strides = [1, 1]} : vector<8x128xf32> to vector<8x32xf32>
    %181 = vector.extract_strided_slice %178 {offsets = [0, 64], sizes = [8, 32], strides = [1, 1]} : vector<8x128xf32> to vector<8x32xf32>
    %182 = vector.extract_strided_slice %178 {offsets = [0, 96], sizes = [8, 32], strides = [1, 1]} : vector<8x128xf32> to vector<8x32xf32>
    %183 = arith.mulf %179, %153 : vector<8x32xf32>
    %184 = arith.mulf %180, %182 : vector<8x32xf32>
    %185 = arith.addf %183, %184 : vector<8x32xf32>
    %186 = math.tanh %185 : vector<8x32xf32>
    %187 = arith.mulf %181, %186 : vector<8x32xf32>
    %188 = vector.extract_strided_slice %14 {offsets = [40, 0], sizes = [8, 128], strides = [1, 1]} : vector<64x128xf32> to vector<8x128xf32>
    %189 = arith.truncf %171 : vector<8x32xf32> to vector<8x32xbf16>
    %cst_36 = arith.constant dense<0.000000e+00> : vector<8x128xf32>
    %190 = tpu.matmul %189, %15, %cst_36 {dimension_numbers = #tpu.dot_dimension_numbers<[1], [0], [0], [1], [0, 0, 1, 1], [], []>} : vector<8x32xbf16>, vector<32x128xbf16>, vector<8x128xf32> -> vector<8x128xf32>
    %191 = arith.addf %188, %190 : vector<8x128xf32>
    %192 = math.tanh %191 : vector<8x128xf32>
    %193 = arith.mulf %192, %5 : vector<8x128xf32>
    %194 = arith.addf %193, %8 : vector<8x128xf32>
    %195 = vector.extract_strided_slice %194 {offsets = [0, 0], sizes = [8, 32], strides = [1, 1]} : vector<8x128xf32> to vector<8x32xf32>
    %196 = vector.extract_strided_slice %194 {offsets = [0, 32], sizes = [8, 32], strides = [1, 1]} : vector<8x128xf32> to vector<8x32xf32>
    %197 = vector.extract_strided_slice %194 {offsets = [0, 64], sizes = [8, 32], strides = [1, 1]} : vector<8x128xf32> to vector<8x32xf32>
    %198 = vector.extract_strided_slice %194 {offsets = [0, 96], sizes = [8, 32], strides = [1, 1]} : vector<8x128xf32> to vector<8x32xf32>
    %199 = arith.mulf %195, %169 : vector<8x32xf32>
    %200 = arith.mulf %196, %198 : vector<8x32xf32>
    %201 = arith.addf %199, %200 : vector<8x32xf32>
    %202 = math.tanh %201 : vector<8x32xf32>
    %203 = arith.mulf %197, %202 : vector<8x32xf32>
    %204 = tpu.concatenate %203, %187 in 1 : vector<8x32xf32>, vector<8x32xf32> -> vector<8x64xf32>
    %205 = arith.truncf %204 : vector<8x64xf32> to vector<8x64xbf16>
    %cst_37 = arith.constant dense<0.000000e+00> : vector<8x128xf32>
    %206 = tpu.matmul %205, %16, %cst_37 {dimension_numbers = #tpu.dot_dimension_numbers<[1], [0], [0], [1], [0, 0, 1, 1], [], []>} : vector<8x64xbf16>, vector<64x128xbf16>, vector<8x128xf32> -> vector<8x128xf32>
    %207 = arith.addf %206, %19 : vector<8x128xf32>
    %208 = math.tanh %207 : vector<8x128xf32>
    %209 = arith.mulf %208, %5 : vector<8x128xf32>
    %210 = arith.addf %209, %8 : vector<8x128xf32>
    %211 = vector.extract_strided_slice %210 {offsets = [0, 0], sizes = [8, 32], strides = [1, 1]} : vector<8x128xf32> to vector<8x32xf32>
    %212 = vector.extract_strided_slice %210 {offsets = [0, 32], sizes = [8, 32], strides = [1, 1]} : vector<8x128xf32> to vector<8x32xf32>
    %213 = vector.extract_strided_slice %210 {offsets = [0, 64], sizes = [8, 32], strides = [1, 1]} : vector<8x128xf32> to vector<8x32xf32>
    %214 = vector.extract_strided_slice %210 {offsets = [0, 96], sizes = [8, 32], strides = [1, 1]} : vector<8x128xf32> to vector<8x32xf32>
    %215 = arith.mulf %211, %185 : vector<8x32xf32>
    %216 = arith.mulf %212, %214 : vector<8x32xf32>
    %217 = arith.addf %215, %216 : vector<8x32xf32>
    %218 = math.tanh %217 : vector<8x32xf32>
    %219 = arith.mulf %213, %218 : vector<8x32xf32>
    %220 = vector.extract_strided_slice %14 {offsets = [48, 0], sizes = [8, 128], strides = [1, 1]} : vector<64x128xf32> to vector<8x128xf32>
    %221 = arith.truncf %203 : vector<8x32xf32> to vector<8x32xbf16>
    %cst_38 = arith.constant dense<0.000000e+00> : vector<8x128xf32>
    %222 = tpu.matmul %221, %15, %cst_38 {dimension_numbers = #tpu.dot_dimension_numbers<[1], [0], [0], [1], [0, 0, 1, 1], [], []>} : vector<8x32xbf16>, vector<32x128xbf16>, vector<8x128xf32> -> vector<8x128xf32>
    %223 = arith.addf %220, %222 : vector<8x128xf32>
    %224 = math.tanh %223 : vector<8x128xf32>
    %225 = arith.mulf %224, %5 : vector<8x128xf32>
    %226 = arith.addf %225, %8 : vector<8x128xf32>
    %227 = vector.extract_strided_slice %226 {offsets = [0, 0], sizes = [8, 32], strides = [1, 1]} : vector<8x128xf32> to vector<8x32xf32>
    %228 = vector.extract_strided_slice %226 {offsets = [0, 32], sizes = [8, 32], strides = [1, 1]} : vector<8x128xf32> to vector<8x32xf32>
    %229 = vector.extract_strided_slice %226 {offsets = [0, 64], sizes = [8, 32], strides = [1, 1]} : vector<8x128xf32> to vector<8x32xf32>
    %230 = vector.extract_strided_slice %226 {offsets = [0, 96], sizes = [8, 32], strides = [1, 1]} : vector<8x128xf32> to vector<8x32xf32>
    %231 = arith.mulf %227, %201 : vector<8x32xf32>
    %232 = arith.mulf %228, %230 : vector<8x32xf32>
    %233 = arith.addf %231, %232 : vector<8x32xf32>
    %234 = math.tanh %233 : vector<8x32xf32>
    %235 = arith.mulf %229, %234 : vector<8x32xf32>
    %236 = tpu.concatenate %235, %219 in 1 : vector<8x32xf32>, vector<8x32xf32> -> vector<8x64xf32>
    %237 = arith.truncf %236 : vector<8x64xf32> to vector<8x64xbf16>
    %cst_39 = arith.constant dense<0.000000e+00> : vector<8x128xf32>
    %238 = tpu.matmul %237, %16, %cst_39 {dimension_numbers = #tpu.dot_dimension_numbers<[1], [0], [0], [1], [0, 0, 1, 1], [], []>} : vector<8x64xbf16>, vector<64x128xbf16>, vector<8x128xf32> -> vector<8x128xf32>
    %239 = arith.addf %238, %19 : vector<8x128xf32>
    %240 = math.tanh %239 : vector<8x128xf32>
    %241 = arith.mulf %240, %5 : vector<8x128xf32>
    %242 = arith.addf %241, %8 : vector<8x128xf32>
    %243 = vector.extract_strided_slice %242 {offsets = [0, 0], sizes = [8, 32], strides = [1, 1]} : vector<8x128xf32> to vector<8x32xf32>
    %244 = vector.extract_strided_slice %242 {offsets = [0, 32], sizes = [8, 32], strides = [1, 1]} : vector<8x128xf32> to vector<8x32xf32>
    %245 = vector.extract_strided_slice %242 {offsets = [0, 64], sizes = [8, 32], strides = [1, 1]} : vector<8x128xf32> to vector<8x32xf32>
    %246 = vector.extract_strided_slice %242 {offsets = [0, 96], sizes = [8, 32], strides = [1, 1]} : vector<8x128xf32> to vector<8x32xf32>
    %247 = arith.mulf %243, %217 : vector<8x32xf32>
    %248 = arith.mulf %244, %246 : vector<8x32xf32>
    %249 = arith.addf %247, %248 : vector<8x32xf32>
    %250 = math.tanh %249 : vector<8x32xf32>
    %251 = arith.mulf %245, %250 : vector<8x32xf32>
    %252 = vector.extract_strided_slice %14 {offsets = [56, 0], sizes = [8, 128], strides = [1, 1]} : vector<64x128xf32> to vector<8x128xf32>
    %253 = arith.truncf %235 : vector<8x32xf32> to vector<8x32xbf16>
    %cst_40 = arith.constant dense<0.000000e+00> : vector<8x128xf32>
    %254 = tpu.matmul %253, %15, %cst_40 {dimension_numbers = #tpu.dot_dimension_numbers<[1], [0], [0], [1], [0, 0, 1, 1], [], []>} : vector<8x32xbf16>, vector<32x128xbf16>, vector<8x128xf32> -> vector<8x128xf32>
    %255 = arith.addf %252, %254 : vector<8x128xf32>
    %256 = math.tanh %255 : vector<8x128xf32>
    %257 = arith.mulf %256, %5 : vector<8x128xf32>
    %258 = arith.addf %257, %8 : vector<8x128xf32>
    %259 = vector.extract_strided_slice %258 {offsets = [0, 0], sizes = [8, 32], strides = [1, 1]} : vector<8x128xf32> to vector<8x32xf32>
    %260 = vector.extract_strided_slice %258 {offsets = [0, 32], sizes = [8, 32], strides = [1, 1]} : vector<8x128xf32> to vector<8x32xf32>
    %261 = vector.extract_strided_slice %258 {offsets = [0, 64], sizes = [8, 32], strides = [1, 1]} : vector<8x128xf32> to vector<8x32xf32>
    %262 = vector.extract_strided_slice %258 {offsets = [0, 96], sizes = [8, 32], strides = [1, 1]} : vector<8x128xf32> to vector<8x32xf32>
    %263 = arith.mulf %259, %233 : vector<8x32xf32>
    %264 = arith.mulf %260, %262 : vector<8x32xf32>
    %265 = arith.addf %263, %264 : vector<8x32xf32>
    %266 = math.tanh %265 : vector<8x32xf32>
    %267 = arith.mulf %261, %266 : vector<8x32xf32>
    %268 = tpu.concatenate %267, %251 in 1 : vector<8x32xf32>, vector<8x32xf32> -> vector<8x64xf32>
    %269 = arith.truncf %268 : vector<8x64xf32> to vector<8x64xbf16>
    %cst_41 = arith.constant dense<0.000000e+00> : vector<8x128xf32>
    %270 = tpu.matmul %269, %16, %cst_41 {dimension_numbers = #tpu.dot_dimension_numbers<[1], [0], [0], [1], [0, 0, 1, 1], [], []>} : vector<8x64xbf16>, vector<64x128xbf16>, vector<8x128xf32> -> vector<8x128xf32>
    %271 = arith.addf %270, %19 : vector<8x128xf32>
    %272 = math.tanh %271 : vector<8x128xf32>
    %273 = arith.mulf %272, %5 : vector<8x128xf32>
    %274 = arith.addf %273, %8 : vector<8x128xf32>
    %275 = vector.extract_strided_slice %274 {offsets = [0, 0], sizes = [8, 32], strides = [1, 1]} : vector<8x128xf32> to vector<8x32xf32>
    %276 = vector.extract_strided_slice %274 {offsets = [0, 32], sizes = [8, 32], strides = [1, 1]} : vector<8x128xf32> to vector<8x32xf32>
    %277 = vector.extract_strided_slice %274 {offsets = [0, 64], sizes = [8, 32], strides = [1, 1]} : vector<8x128xf32> to vector<8x32xf32>
    %278 = vector.extract_strided_slice %274 {offsets = [0, 96], sizes = [8, 32], strides = [1, 1]} : vector<8x128xf32> to vector<8x32xf32>
    %279 = arith.mulf %275, %249 : vector<8x32xf32>
    %280 = arith.mulf %276, %278 : vector<8x32xf32>
    %281 = arith.addf %279, %280 : vector<8x32xf32>
    %282 = math.tanh %281 : vector<8x32xf32>
    %283 = arith.mulf %277, %282 : vector<8x32xf32>
    %c0_42 = arith.constant 0 : index
    %c0_43 = arith.constant 0 : index
    %284 = vector.load %arg8[%c0_42, %c0_43] : memref<1x32xf32, #tpu.memory_space<vmem>>, vector<1x32xf32>
    %285 = vector.broadcast %284 : vector<1x32xf32> to vector<8x32xf32>
    %286 = arith.mulf %283, %285 : vector<8x32xf32>
    %cst_44 = arith.constant dense<0.000000e+00> : vector<8xf32>
    %287 = vector.multi_reduction <add>, %286, %cst_44 [1] : vector<8x32xf32> to vector<8xf32>
    %288 = vector.shape_cast %287 : vector<8xf32> to vector<8x1xf32>
    %c0_45 = arith.constant 0 : index
    %c0_46 = arith.constant 0 : index
    %289 = vector.load %arg9[%c0_45, %c0_46] : memref<1x1xf32, #tpu.memory_space<vmem>>, vector<1x1xf32>
    %290 = vector.broadcast %289 : vector<1x1xf32> to vector<8x1xf32>
    %291 = arith.addf %288, %290 : vector<8x1xf32>
    %c0_47 = arith.constant 0 : index
    %c0_48 = arith.constant 0 : index
    %292 = vector.load %arg10[%c0_47, %c0_48] : memref<8x1xf32, #tpu.memory_space<vmem>>, vector<8x1xf32>
    tpu.vector_store %arg10[%c0_47, %c0_48], %291 {strides = array<i32>} : memref<8x1xf32, #tpu.memory_space<vmem>>, vector<8x1xf32>,
    return
  }
}

</mosaic_0001>

<bundles_post_ra>
// kernel: split.51
= control target key start
LH: loop header
LB: loop body
LE: loop exit
PB: predicated region body
PF: predicated region fallthrough
CT: control target
= control target key end

     0   :  { %v3_v0 = vlaneseq  ;;  %s198_s0 = inlined_call_operand.vmem [shape: f32[64,128], index: 0, kind: input, shape index: {}]   ;;  %s199_s1 = inlined_call_operand.vmem [shape: bf16[64,32], index: 1, kind: output, shape index: {}]  }
   0x1   :  { %v102_v1 = vld [vmem:[%s198_s0 + $0x20] sm:$0xff]  ;;  %v104_v3 = vld [vmem:[%s198_s0 + $0x28] sm:$0xff]  ;;  %v106_v10 = vld [vmem:[%s198_s0 + $0x30] sm:$0xff] }
   0x2   :  { %v4_v2 = vand.u32 127, %v3_v0  ;;  %v2_v4 = vld [vmem:[%s198_s0] sm:$0xff]  ;;  %v96_v5 = vld [vmem:[%s198_s0 + $0x8] sm:$0xff]  ;;  %v108_v13 = vld [vmem:[%s198_s0 + $0x38] sm:$0xff] }
   0x3   :  { %v98_v14 = vld [vmem:[%s198_s0 + $0x10] sm:$0xff]  ;;  %v100_v15 = vld [vmem:[%s198_s0 + $0x18] sm:$0xff]  ;;  %s131_s0 = smov 64  }
   0x4   :  { %vm5_vm0 = vcmp.lt.s32.totalorder %v4_v2, 64 }
   0x5   :  { %v53_v6 = vsel %vm5_vm0, 0, %v102_v1  ;;  %v65_v7 = vsel %vm5_vm0, 0, %v104_v3  ;;  %v6_v8 = vsel %vm5_vm0, 0, %v2_v4  ;;  %v17_v9 = vsel %vm5_vm0, 0, %v96_v5 }
   0x6   :  { %v121_v11 = vpack.i.bf16 %v65_v7, %v53_v6  ;;  %v111_v12 = vpack.i.bf16 %v17_v9, %v6_v8  ;;  %v77_v16 = vsel %vm5_vm0, 0, %v106_v10  ;;  %v89_v17 = vsel %vm5_vm0, 0, %v108_v13 }
   0x7   :  { %v29_v18 = vsel %vm5_vm0, 0, %v98_v14  ;;  %v41_v19 = vsel %vm5_vm0, 0, %v100_v15  ;;  %v126_v20 = vpack.i.bf16 %v89_v17, %v77_v16 }
   0x8   :  { %122 = vrot.lane.b32.xlu1 %v121_v11, %s131_s0  ;;  %112 = vrot.lane.b32.xlu0 %v111_v12, %s131_s0  ;;  %v116_v21 = vpack.i.bf16 %v41_v19, %v29_v18 }
  0x10   :  { %127 = vrot.lane.b32.xlu1 %v126_v20, %s131_s0  ;;  %117 = vrot.lane.b32.xlu0 %v116_v21, %s131_s0 }
  0x7a   :  { %v123_v22 = vpop.permute.xlu1 %122  ;;  %v113_v23 = vpop.permute.xlu0 %112 }
  0x7b   :  { %v125_v24 = vunpack.i.h.bf16 %v123_v22  ;;  %v124_v25 = vunpack.i.l.bf16 %v123_v22  ;;  %v115_v26 = vunpack.i.h.bf16 %v113_v23  ;;  %v114_v27 = vunpack.i.l.bf16 %v113_v23 }
  0x7d   :  { %v70_v28 = vpack.c.bf16 0.0, %v125_v24  ;;  %v58_v29 = vpack.c.bf16 0.0, %v124_v25  ;;  %v22_v30 = vpack.c.bf16 0.0, %v115_v26  ;;  %v10_v31 = vpack.c.bf16 0.0, %v114_v27 }
  0x7f   :  { %105 = vst [vmem:[%s199_s1 + $0x14] sm:$0xf] %v70_v28 }
  0x80   :  { %103 = vst [vmem:[%s199_s1 + $0x10] sm:$0xf] %v58_v29 }
  0x81   :  { %97 = vst [vmem:[%s199_s1 + $0x4] sm:$0xf] %v22_v30 }
  0x82   :  { %11 = vst [vmem:[%s199_s1] sm:$0xf] %v10_v31  ;;  %v128_v32 = vpop.permute.xlu1 %127  ;;  %v118_v33 = vpop.permute.xlu0 %117 }
  0x83   :  { %v130_v34 = vunpack.i.h.bf16 %v128_v32  ;;  %v129_v35 = vunpack.i.l.bf16 %v128_v32  ;;  %v120_v36 = vunpack.i.h.bf16 %v118_v33  ;;  %v119_v37 = vunpack.i.l.bf16 %v118_v33 }
  0x85   :  { %v94_v38 = vpack.c.bf16 0.0, %v130_v34  ;;  %v82_v39 = vpack.c.bf16 0.0, %v129_v35  ;;  %v46_v40 = vpack.c.bf16 0.0, %v120_v36  ;;  %v34_v41 = vpack.c.bf16 0.0, %v119_v37 }
  0x87   :  { %109 = vst [vmem:[%s199_s1 + $0x1c] sm:$0xf] %v94_v38 }
  0x88   :  { %107 = vst [vmem:[%s199_s1 + $0x18] sm:$0xf] %v82_v39 }
  0x89   :  { %101 = vst [vmem:[%s199_s1 + $0xc] sm:$0xf] %v46_v40 }
  0x8a   :  { %99 = vst [vmem:[%s199_s1 + $0x8] sm:$0xf] %v34_v41 }

// kernel: split.52
= control target key start
LH: loop header
LB: loop body
LE: loop exit
PB: predicated region body
PF: predicated region fallthrough
CT: control target
= control target key end

     0   :  { %v3_v0 = vlaneseq  ;;  %s100_s0 = inlined_call_operand.vmem [shape: f32[32,128], index: 0, kind: input, shape index: {}]   ;;  %s101_s1 = inlined_call_operand.vmem [shape: bf16[32,32], index: 1, kind: output, shape index: {}]  }
   0x1   :  { %v2_v1 = vld [vmem:[%s100_s0] sm:$0xff]  ;;  %v48_v3 = vld [vmem:[%s100_s0 + $0x8] sm:$0xff]  ;;  %v50_v7 = vld [vmem:[%s100_s0 + $0x10] sm:$0xff] }
   0x2   :  { %v4_v2 = vand.u32 127, %v3_v0  ;;  %v52_v8 = vld [vmem:[%s100_s0 + $0x18] sm:$0xff]  ;;  %s65_s0 = smov 64  }
   0x4   :  { %vm5_vm0 = vcmp.lt.s32.totalorder %v4_v2, 64 }
   0x5   :  { %v6_v4 = vsel %vm5_vm0, 0, %v2_v1  ;;  %v17_v5 = vsel %vm5_vm0, 0, %v48_v3  ;;  %v29_v9 = vsel %vm5_vm0, 0, %v50_v7  ;;  %v41_v10 = vsel %vm5_vm0, 0, %v52_v8 }
   0x6   :  { %v55_v6 = vpack.i.bf16 %v17_v5, %v6_v4  ;;  %v60_v11 = vpack.i.bf16 %v41_v10, %v29_v9 }
   0x8   :  { %56 = vrot.lane.b32.xlu0 %v55_v6, %s65_s0 }
  0x10   :  { %61 = vrot.lane.b32.xlu0 %v60_v11, %s65_s0 }
  0x7a   :  { %v57_v12 = vpop.permute.xlu0 %56 }
  0x7b   :  { %v59_v13 = vunpack.i.h.bf16 %v57_v12  ;;  %v58_v14 = vunpack.i.l.bf16 %v57_v12 }
  0x7d   :  { %v22_v15 = vpack.c.bf16 0.0, %v59_v13  ;;  %v10_v16 = vpack.c.bf16 0.0, %v58_v14 }
  0x7f   :  { %49 = vst [vmem:[%s101_s1 + $0x4] sm:$0xf] %v22_v15 }
  0x80   :  { %11 = vst [vmem:[%s101_s1] sm:$0xf] %v10_v16 }
  0x82   :  { %v62_v17 = vpop.permute.xlu0 %61 }
  0x83   :  { %v64_v18 = vunpack.i.h.bf16 %v62_v17  ;;  %v63_v19 = vunpack.i.l.bf16 %v62_v17 }
  0x85   :  { %v46_v20 = vpack.c.bf16 0.0, %v64_v18  ;;  %v34_v21 = vpack.c.bf16 0.0, %v63_v19 }
  0x87   :  { %53 = vst [vmem:[%s101_s1 + $0xc] sm:$0xf] %v46_v20 }
  0x88   :  { %51 = vst [vmem:[%s101_s1 + $0x8] sm:$0xf] %v34_v21 }

// kernel: split.2
= control target key start
LH: loop header
LB: loop body
LE: loop exit
PB: predicated region body
PF: predicated region fallthrough
CT: control target
= control target key end

     0   :  { %v5_v0 = vlaneseq  ;;  %s31_s0 = inlined_call_operand.vmem [shape: bf16[8,128], index: 0, kind: input, shape index: {}]   ;;  %s32_s1 = inlined_call_operand.vmem [shape: bf16[8,32], index: 1, kind: output, shape index: {}]  }
   0x1   :  { %v2_v1 = vld [vmem:[%s31_s0] sm:$0xf]  ;;  %s14_s0 = smov 64  }
   0x2   :  { %v3_v2 = vunpack.c.l.bf16 %v2_v1  ;;  %v6_v3 = vand.u32 127, %v5_v0 }
   0x4   :  { %vm7_vm0 = vcmp.lt.s32.totalorder %v6_v3, 64 }
   0x5   :  { %v8_v4 = vsel %vm7_vm0, 0, %v3_v2 }
   0x6   :  { %9 = vrot.lane.b32.xlu0 %v8_v4, %s14_s0 }
  0x78   :  { %v10_v5 = vpop.permute.xlu0 %9 }
  0x79   :  { %v11_v6 = vpack.c.bf16 0.0, %v10_v5 }
  0x7b   :  { %12 = vst [vmem:[%s32_s1] sm:$0xf] %v11_v6 }

// kernel: lstm_forward.1
= control target key start
LH: loop header
LB: loop body
LE: loop exit
PB: predicated region body
PF: predicated region fallthrough
CT: control target
= control target key end

     0   :  { %vm89_vm0 = vcmask 1043456   ;;  %vm76_vm1 = vcmask 64512   ;;  %vm157_vm2 = vcmask 261120   ;;  %v38_v9 = vlaneseq  ;;  %s1048_s23 = smov 96   ;;  %s1049_s30 = smov 32   ;;  %s1394_s1 = inlined_call_operand.vmem [shape: bf16[8,128], index: 1, kind: input, shape index: {}]   ;;  %s1395_s2 = inlined_call_operand.vmem [shape: bf16[32,128], index: 2, kind: input, shape index: {}]   ;;  %s1396_s0 = inlined_call_operand.vmem [shape: bf16[64,8], index: 0, kind: input, shape index: {}]   ;;  %s1397_s6 = inlined_call_operand.vmem [shape: f32[2,8,32], index: 6, kind: input, shape index: {}]   ;;  %s1398_s3 = inlined_call_operand.vmem [shape: f32[1,128], index: 3, kind: input, shape index: {}]   ;;  %s1399_s7 = inlined_call_operand.vmem [shape: f32[2,8,32], index: 7, kind: input, shape index: {}]   ;;  %s1400_s4 = inlined_call_operand.vmem [shape: bf16[64,128], index: 4, kind: input, shape index: {}]   ;;  %s1401_s5 = inlined_call_operand.vmem [shape: f32[1,128], index: 5, kind: input, shape index: {}]   ;;  %s1402_s8 = inlined_call_operand.vmem [shape: f32[1,32], index: 8, kind: input, shape index: {}]   ;;  %s1403_s9 = inlined_call_operand.<no memory space> [shape: f32[1,1], index: 9, kind: input, shape index: {}]   ;;  %s1404_s10 = inlined_call_operand.vmem [shape: f32[8,1], index: 10, kind: output, shape index: {}]  }
   0x1   :  { %v51_v0 = vld [vmem:[%s1394_s1] sm:$0xf]  ;;  %v1111_v1 = vld [vmem:[%s1395_s2 + $0x8] sm:$0xff]  ;;  %v1045_v14 = vmov 1.0   ;;  %v1046_v18 = vmov 0.0   ;;  %v1158_v29 = vld [vmem:[%s1400_s4 + $0x18] sm:$0xff] }
   0x2   :  { %v91_v2 = vsel %vm89_vm0, %v51_v0, 0  ;;  %v962_v3 = vld [vmem:[%s1396_s0] sm:$0xff]  ;;  %167 = vmatpush.bf16.msra.mxu1 %v1111_v1  ;;  %279 = vmatpush.bf16.msra.mxu3 %v1111_v1  ;;  %v39_v11 = vand.u32 127, %v38_v9  ;;  %v920_v33 = vld [vmem:[%s1397_s6 + $0x8] sm:$0xff]  ;;  %v1170_v34 = vld [vmem:[%s1400_s4 + $0x10] sm:$0xff]  ;;  %vm229_vm4 = vcmask 523264  }
   0x3   :  { %100 = vmatpush.bf16.msra.mxu0 %v91_v2  ;;  %v1120_v4 = vld [vmem:[%s1395_s2] sm:$0xff]  ;;  %237 = vmatpush.bf16.msra.mxu2 %v1158_v29  ;;  %v1176_v35 = vld [vmem:[%s1400_s4 + $0x8] sm:$0xff]  ;;  %vm894_vm5 = vcmask 7168  }
   0x4   :  { %v138_v5 = vld [vmem:[%s1397_s6] sm:$0xff]  ;;  %vm40_vm3 = vcmp.lt.s32.totalorder %v39_v11, 96  ;;  %v921_v0 = vld [vmem:[%s1399_s7 + $0x8] sm:$0xff] }
   0x5   :  { %v144_v6 = vpack.c.bf16 %v138_v5, %v138_v5  ;;  %v1137_v7 = vld [vmem:[%s1398_s3] ss:$0 sm:$0xff]  ;;  %v1140_v15 = vsel %vm40_vm3, 0.5, %v1045_v14  ;;  %v1142_v19 = vsel %vm40_vm3, 0.5, %v1046_v18  ;;  %s1047_s3 = smov 64   ;;  %v963_v14 = vld [vmem:[%s1396_s0 + $0x8] sm:$0xff] }
   0x6   :  { %916 = vmatmul.msk.bf16.vlgmr.msra.gmra.mxu0 %vm76_vm1, %v962_v3  ;;  %168 = vmatpush.bf16.msra.mxu1 %v1120_v4  ;;  %v141_v24 = vld [vmem:[%s1399_s7] sm:$0xff] }
   0x7   :  { %714 = vmatpush.bf16.msrb.mxu0 %v1111_v1  ;;  %280 = vmatpush.bf16.msra.mxu3 %v1120_v4  ;;  %v1184_v36 = vld [vmem:[%s1400_s4] sm:$0xff] }
   0x8   :  { %238 = vmatpush.bf16.msra.mxu2 %v1170_v34  ;;  %v1206_v42 = vld [vmem:[%s1401_s5] ss:$0 sm:$0xff] }
   0x9   :  { %930 = vmatmul.msk.bf16.vlgmr.msra.gmra.mxu1 %vm157_vm2, %v144_v6 }
   0xa   :  { %324 = vmatpush.bf16.msrb.mxu1 %v1158_v29 }
   0xb   :  { %715 = vmatpush.bf16.msrb.mxu0 %v1120_v4  ;;  %366 = vmatpush.bf16.msrb.mxu3 %v1111_v1 }
   0xc   :  { %239 = vmatpush.bf16.msra.mxu2 %v1176_v35 }
   0xe   :  { %325 = vmatpush.bf16.msrb.mxu1 %v1170_v34 }
   0xf   :  { %367 = vmatpush.bf16.msrb.mxu3 %v1120_v4 }
  0x10   :  { %240 = vmatpush.bf16.msra.mxu2 %v1184_v36 }
  0x12   :  { %326 = vmatpush.bf16.msrb.mxu1 %v1176_v35 }
  0x14   :  { %411 = vmatpush.bf16.msrb.mxu2 %v1158_v29 }
  0x16   :  { %327 = vmatpush.bf16.msrb.mxu1 %v1184_v36  ;;  %917 = vmatmul.msk.bf16.gmra.mxu0 %vm76_vm1, %v963_v14 }
  0x18   :  { %412 = vmatpush.bf16.msrb.mxu2 %v1170_v34 }
  0x1a   :  { %453 = vmatpush.bf16.msra.mxu1 %v1111_v1 }
  0x1c   :  { %413 = vmatpush.bf16.msrb.mxu2 %v1176_v35 }
  0x1e   :  { %454 = vmatpush.bf16.msra.mxu1 %v1120_v4 }
  0x20   :  { %414 = vmatpush.bf16.msrb.mxu2 %v1184_v36 }
  0x83   :  { %v102_v8 = vpop.f32.mrf.mxu0 }
  0x84   :  { %v103_v10 = vadd.f32 %v1137_v7, %v102_v8 }
  0x86   :  { %v170_v12 = vpop.f32.mrf.mxu1 }
  0x87   :  { %v174_v13 = vadd.f32 %v170_v12, %v103_v10 }
  0x89   :  { %981 = vtanh.f32 %v174_v13 }
  0x8b   :  { %v104_v48 = vpop.f32.mrf.mxu0 }
  0x8c   :  { %v105_v50 = vadd.f32 %v1137_v7, %v104_v48 }
  0x8e   :  { %v172_v16 = vpop.f32.mrf.mxu1 }
  0x8f   :  { %v982_v17 = vpop.eup %981 }
  0x90   :  { %v176_v20 = vmul.f32 %v982_v17, %v1140_v15 }
  0x92   :  { %v177_v21 = vadd.f32 %v176_v20, %v1142_v19 }
  0x94   :  { %180 = vrot.lane.b32.xlu0 %v177_v21, %s1047_s3  ;;  %v178_v25 = vmul.f32 %v177_v21, %v141_v24 }
 0x106   :  { %v181_v22 = vpop.permute.xlu0 %180 }
 0x107   :  { %v183_v23 = vmul.f32 %v181_v22, %v177_v21 }
 0x109   :  { %185 = vrot.lane.b32.xlu0 %v183_v23, %s1048_s23  ;;  %v107_v23 = vpop.f32.mrf.mxu0 }
 0x17b   :  { %v186_v26 = vpop.permute.xlu0 %185 }
 0x17c   :  { %v1151_v27 = vadd.f32 %v186_v26, %v178_v25  ;;  %v108_v25 = vadd.f32 %v1137_v7, %v107_v23 }
 0x17e   :  { %983 = vtanh.f32 %v1151_v27 }
 0x184   :  { %v984_v28 = vpop.eup %983 }
 0x185   :  { %191 = vrot.lane.b32.xlu1 %v984_v28, %s1047_s3 }
 0x1f7   :  { %v192_v30 = vpop.permute.xlu1 %191 }
 0x1f8   :  { %v194_v31 = vmul.f32 %v192_v30, %v177_v21 }
 0x1fa   :  { %v266_v32 = vpack.c.bf16 %v194_v31, %v194_v31  ;;  %196 = vrot.lane.b32.xlu2 %v194_v31, %s1047_s3 }
 0x1fc   :  { %268 = vrot.lane.b32.xlu1 %v266_v32, %s1047_s3 }
 0x202   :  { %200 = vrot.lane.b32.xlu2 %v920_v33, %s1049_s30 }
 0x254   :  { %v197_v37 = vpop.permute.xlu2 %196 }
 0x25c   :  { %v201_v38 = vpop.permute.xlu2 %200 }
 0x25d   :  { %v203_v39 = vsel %vm157_vm2, %v197_v37, %v201_v38 }
 0x25e   :  { %v204_v40 = vpack.c.bf16 %v203_v39, %v203_v39 }
 0x260   :  { %947 = vmatmul.msk.bf16.vlgmr.msra.gmra.mxu2 %vm229_vm4, %v204_v40 }
 0x261   :  { %540 = vmatpush.bf16.msra.mxu2 %v1111_v1 }
 0x265   :  { %541 = vmatpush.bf16.msra.mxu2 %v1120_v4 }
 0x26e   :  { %v269_v41 = vpop.permute.xlu1 %268 }
 0x26f   :  { %948 = vmatmul.msk.bf16.vlgmr.msra.gmra.mxu3 %vm157_vm2, %v269_v41 }
 0x270   :  { %498 = vmatpush.bf16.msra.mxu3 %v1158_v29 }
 0x274   :  { %499 = vmatpush.bf16.msra.mxu3 %v1170_v34 }
 0x278   :  { %500 = vmatpush.bf16.msra.mxu3 %v1176_v35 }
 0x27c   :  { %501 = vmatpush.bf16.msra.mxu3 %v1184_v36 }
 0x2e3   :  { %v242_v43 = vpop.f32.mrf.mxu2 }
 0x2e4   :  { %v243_v44 = vadd.f32 %v1206_v42, %v242_v43 }
 0x2e6   :  { %985 = vtanh.f32 %v243_v44 }
 0x2eb   :  { %v244_v45 = vpop.f32.mrf.mxu2 }
 0x2ec   :  { %v986_v46 = vpop.eup %985 }
 0x2ed   :  { %v247_v47 = vmul.f32 %v986_v46, %v1140_v15 }
 0x2ef   :  { %v248_v49 = vadd.f32 %v247_v47, %v1142_v19 }
 0x2f1   :  { %251 = vrot.lane.b32.xlu1 %v248_v49, %s1047_s3  ;;  %v249_v2 = vmul.f32 %v921_v0, %v248_v49 }
 0x2f2   :  { %v282_v51 = vpop.f32.mrf.mxu3 }
 0x2f3   :  { %v286_v52 = vadd.f32 %v282_v51, %v105_v50 }
 0x2f5   :  { %987 = vtanh.f32 %v286_v52 }
 0x2fa   :  { %v284_v53 = vpop.f32.mrf.mxu3 }
 0x2fb   :  { %v988_v54 = vpop.eup %987 }
 0x2fc   :  { %v288_v55 = vmul.f32 %v988_v54, %v1140_v15 }
 0x2fe   :  { %v289_v56 = vadd.f32 %v288_v55, %v1142_v19 }
 0x300   :  { %292 = vrot.lane.b32.xlu0 %v289_v56, %s1047_s3  ;;  %v290_v61 = vmul.f32 %v289_v56, %v1151_v27 }
 0x363   :  { %v252_v57 = vpop.permute.xlu1 %251 }
 0x364   :  { %v254_v58 = vmul.f32 %v252_v57, %v248_v49 }
 0x366   :  { %256 = vrot.lane.b32.xlu0 %v254_v58, %s1048_s23 }
 0x372   :  { %v293_v59 = vpop.permute.xlu0 %292 }
 0x373   :  { %v295_v60 = vmul.f32 %v293_v59, %v289_v56 }
 0x375   :  { %297 = vrot.lane.b32.xlu2 %v295_v60, %s1048_s23 }
 0x3cf   :  { %v298_v62 = vpop.permute.xlu2 %297 }
 0x3d0   :  { %v1219_v63 = vadd.f32 %v298_v62, %v290_v61 }
 0x3d2   :  { %989 = vtanh.f32 %v1219_v63 }
 0x3d8   :  { %v990_v3 = vpop.eup %989  ;;  %v257_v5 = vpop.permute.xlu0 %256 }
 0x3d9   :  { %v259_v6 = vadd.f32 %v257_v5, %v249_v2  ;;  %303 = vrot.lane.b32.xlu1 %v990_v3, %s1047_s3 }
 0x3db   :  { %991 = vtanh.f32 %v259_v6 }
 0x3e1   :  { %v992_v8 = vpop.eup %991 }
 0x3e2   :  { %262 = vrot.lane.b32.xlu2 %v992_v8, %s1047_s3 }
 0x43c   :  { %v263_v9 = vpop.permute.xlu2 %262 }
 0x43d   :  { %v265_v10 = vmul.f32 %v263_v9, %v248_v49 }
 0x43f   :  { %312 = vrot.lane.b32.xlu2 %v265_v10, %s1048_s23 }
 0x44b   :  { %v304_v11 = vpop.permute.xlu1 %303 }
 0x44c   :  { %v306_v12 = vmul.f32 %v304_v11, %v289_v56 }
 0x44e   :  { %v353_v13 = vpack.c.bf16 %v306_v12, %v306_v12  ;;  %308 = vrot.lane.b32.xlu1 %v306_v12, %s1047_s3 }
 0x450   :  { %355 = vrot.lane.b32.xlu0 %v353_v13, %s1047_s3 }
 0x499   :  { %v313_v16 = vpop.permute.xlu2 %312 }
 0x4c0   :  { %v309_v17 = vpop.permute.xlu1 %308 }
 0x4c1   :  { %v315_v18 = vsel %vm157_vm2, %v309_v17, %v313_v16 }
 0x4c2   :  { %v316_v20 = vpack.c.bf16 %v315_v18, %v315_v18  ;;  %v356_v21 = vpop.permute.xlu0 %355 }
 0x4c3   :  { %950 = vmatmul.msk.bf16.vlgmr.msrb.gmra.mxu3 %vm157_vm2, %v356_v21 }
 0x4c4   :  { %949 = vmatmul.msk.bf16.vlgmr.msrb.gmra.mxu1 %vm229_vm4, %v316_v20  ;;  %627 = vmatpush.bf16.msrb.mxu3 %v1111_v1 }
 0x4c5   :  { %585 = vmatpush.bf16.msrb.mxu1 %v1158_v29 }
 0x4c8   :  { %628 = vmatpush.bf16.msrb.mxu3 %v1120_v4 }
 0x4c9   :  { %586 = vmatpush.bf16.msrb.mxu1 %v1170_v34 }
 0x4cd   :  { %587 = vmatpush.bf16.msrb.mxu1 %v1176_v35 }
 0x4d1   :  { %588 = vmatpush.bf16.msrb.mxu1 %v1184_v36 }
 0x541   :  { %v329_v22 = vpop.f32.mrf.mxu1 }
 0x542   :  { %v330_v24 = vadd.f32 %v1206_v42, %v329_v22 }
 0x544   :  { %993 = vtanh.f32 %v330_v24 }
 0x546   :  { %v369_v26 = vpop.f32.mrf.mxu3 }
 0x547   :  { %v373_v27 = vadd.f32 %v369_v26, %v108_v25 }
 0x549   :  { %995 = vtanh.f32 %v373_v27  ;;  %v331_v28 = vpop.f32.mrf.mxu1 }
 0x54a   :  { %v994_v30 = vpop.eup %993 }
 0x54b   :  { %v334_v31 = vmul.f32 %v994_v30, %v1140_v15 }
 0x54d   :  { %v335_v32 = vadd.f32 %v334_v31, %v1142_v19 }
 0x54e   :  { %v371_v33 = vpop.f32.mrf.mxu3 }
 0x54f   :  { %v996_v37 = vpop.eup %995  ;;  %338 = vrot.lane.b32.xlu0 %v335_v32, %s1047_s3  ;;  %v336_v45 = vmul.f32 %v335_v32, %v259_v6  ;;  %v964_v33 = vld [vmem:[%s1396_s0 + $0x10] sm:$0xff] }
 0x550   :  { %v375_v38 = vmul.f32 %v996_v37, %v1140_v15  ;;  %918 = vmatmul.msk.bf16.gmra.mxu0 %vm76_vm1, %v964_v33 }
 0x552   :  { %v376_v39 = vadd.f32 %v375_v38, %v1142_v19 }
 0x554   :  { %379 = vrot.lane.b32.xlu1 %v376_v39, %s1047_s3  ;;  %v377_v49 = vmul.f32 %v376_v39, %v1219_v63  ;;  %v109_v63 = vpop.f32.mrf.mxu0 }
 0x555   :  { %v110_v0 = vadd.f32 %v1137_v7, %v109_v63 }
 0x5c1   :  { %v339_v40 = vpop.permute.xlu0 %338 }
 0x5c2   :  { %v341_v41 = vmul.f32 %v339_v40, %v335_v32 }
 0x5c4   :  { %343 = vrot.lane.b32.xlu2 %v341_v41, %s1048_s23 }
 0x5c6   :  { %v380_v43 = vpop.permute.xlu1 %379 }
 0x5c7   :  { %v382_v44 = vmul.f32 %v380_v43, %v376_v39 }
 0x5c9   :  { %384 = vrot.lane.b32.xlu0 %v382_v44, %s1048_s23 }
 0x61e   :  { %v344_v46 = vpop.permute.xlu2 %343 }
 0x61f   :  { %v1253_v47 = vadd.f32 %v344_v46, %v336_v45  ;;  %v112_v46 = vpop.f32.mrf.mxu0 }
 0x621   :  { %997 = vtanh.f32 %v1253_v47 }
 0x627   :  { %v998_v48 = vpop.eup %997 }
 0x628   :  { %349 = vrot.lane.b32.xlu1 %v998_v48, %s1047_s3 }
 0x63b   :  { %v385_v50 = vpop.permute.xlu0 %384 }
 0x63c   :  { %v387_v51 = vadd.f32 %v385_v50, %v377_v49 }
 0x63e   :  { %999 = vtanh.f32 %v387_v51 }
 0x644   :  { %v1000_v52 = vpop.eup %999 }
 0x645   :  { %390 = vrot.lane.b32.xlu2 %v1000_v52, %s1047_s3 }
 0x69a   :  { %v350_v53 = vpop.permute.xlu1 %349 }
 0x69b   :  { %v352_v54 = vmul.f32 %v350_v53, %v335_v32 }
 0x69d   :  { %399 = vrot.lane.b32.xlu1 %v352_v54, %s1048_s23 }
 0x69f   :  { %v391_v55 = vpop.permute.xlu2 %390 }
 0x6a0   :  { %v393_v56 = vmul.f32 %v391_v55, %v376_v39 }
 0x6a2   :  { %v440_v57 = vpack.c.bf16 %v393_v56, %v393_v56  ;;  %395 = vrot.lane.b32.xlu0 %v393_v56, %s1047_s3 }
 0x6a4   :  { %442 = vrot.lane.b32.xlu2 %v440_v57, %s1047_s3 }
 0x6fe   :  { %v443_v58 = vpop.permute.xlu2 %442 }
 0x6ff   :  { %952 = vmatmul.msk.bf16.vlgmr.msra.gmra.mxu1 %vm157_vm2, %v443_v58 }
 0x700   :  { %759 = vmatpush.bf16.msra.mxu1 %v1158_v29 }
 0x704   :  { %760 = vmatpush.bf16.msra.mxu1 %v1170_v34 }
 0x708   :  { %761 = vmatpush.bf16.msra.mxu1 %v1176_v35 }
 0x70c   :  { %762 = vmatpush.bf16.msra.mxu1 %v1184_v36 }
 0x70f   :  { %v400_v59 = vpop.permute.xlu1 %399 }
 0x714   :  { %v396_v60 = vpop.permute.xlu0 %395 }
 0x715   :  { %v402_v61 = vsel %vm157_vm2, %v396_v60, %v400_v59 }
 0x716   :  { %v403_v62 = vpack.c.bf16 %v402_v61, %v402_v61 }
 0x718   :  { %951 = vmatmul.msk.bf16.vlgmr.msrb.gmra.mxu2 %vm229_vm4, %v403_v62 }
 0x719   :  { %672 = vmatpush.bf16.msrb.mxu2 %v1158_v29 }
 0x71d   :  { %673 = vmatpush.bf16.msrb.mxu2 %v1170_v34 }
 0x721   :  { %674 = vmatpush.bf16.msrb.mxu2 %v1176_v35 }
 0x725   :  { %675 = vmatpush.bf16.msrb.mxu2 %v1184_v36 }
 0x77c   :  { %v456_v2 = vpop.f32.mrf.mxu1 }
 0x77d   :  { %v460_v3 = vadd.f32 %v456_v2, %v110_v0 }
 0x77f   :  { %1001 = vtanh.f32 %v460_v3 }
 0x784   :  { %v458_v5 = vpop.f32.mrf.mxu1 }
 0x785   :  { %v1002_v6 = vpop.eup %1001 }
 0x786   :  { %v462_v8 = vmul.f32 %v1002_v6, %v1140_v15 }
 0x788   :  { %v463_v9 = vadd.f32 %v462_v8, %v1142_v19 }
 0x78a   :  { %466 = vrot.lane.b32.xlu0 %v463_v9, %s1047_s3  ;;  %v464_v22 = vmul.f32 %v463_v9, %v387_v51 }
 0x79b   :  { %v416_v10 = vpop.f32.mrf.mxu2 }
 0x79c   :  { %v417_v11 = vadd.f32 %v1206_v42, %v416_v10 }
 0x79e   :  { %1003 = vtanh.f32 %v417_v11 }
 0x7a3   :  { %v418_v12 = vpop.f32.mrf.mxu2 }
 0x7a4   :  { %v1004_v13 = vpop.eup %1003 }
 0x7a5   :  { %v421_v14 = vmul.f32 %v1004_v13, %v1140_v15 }
 0x7a7   :  { %v422_v16 = vadd.f32 %v421_v14, %v1142_v19 }
 0x7a9   :  { %425 = vrot.lane.b32.xlu1 %v422_v16, %s1047_s3  ;;  %v423_v26 = vmul.f32 %v422_v16, %v1253_v47 }
 0x7fc   :  { %v467_v17 = vpop.permute.xlu0 %466 }
 0x7fd   :  { %v469_v18 = vmul.f32 %v467_v17, %v463_v9  ;;  %v114_v17 = vpop.f32.mrf.mxu0 }
 0x7ff   :  { %471 = vrot.lane.b32.xlu2 %v469_v18, %s1048_s23 }
 0x81b   :  { %v426_v20 = vpop.permute.xlu1 %425 }
 0x81c   :  { %v428_v21 = vmul.f32 %v426_v20, %v422_v16  ;;  %v115_v20 = vadd.f32 %v1137_v7, %v114_v17 }
 0x81e   :  { %430 = vrot.lane.b32.xlu0 %v428_v21, %s1048_s23 }
 0x859   :  { %v472_v23 = vpop.permute.xlu2 %471 }
 0x85a   :  { %v474_v24 = vadd.f32 %v472_v23, %v464_v22 }
 0x85c   :  { %1005 = vtanh.f32 %v474_v24 }
 0x862   :  { %v1006_v25 = vpop.eup %1005 }
 0x863   :  { %477 = vrot.lane.b32.xlu1 %v1006_v25, %s1047_s3 }
 0x890   :  { %v431_v27 = vpop.permute.xlu0 %430 }
 0x891   :  { %v433_v28 = vadd.f32 %v431_v27, %v423_v26 }
 0x893   :  { %1007 = vtanh.f32 %v433_v28 }
 0x899   :  { %v1008_v30 = vpop.eup %1007 }
 0x89a   :  { %436 = vrot.lane.b32.xlu2 %v1008_v30, %s1047_s3 }
 0x8d5   :  { %v478_v31 = vpop.permute.xlu1 %477 }
 0x8d6   :  { %v480_v32 = vmul.f32 %v478_v31, %v463_v9 }
 0x8d8   :  { %v527_v37 = vpack.c.bf16 %v480_v32, %v480_v32  ;;  %482 = vrot.lane.b32.xlu1 %v480_v32, %s1047_s3 }
 0x8da   :  { %529 = vrot.lane.b32.xlu0 %v527_v37, %s1047_s3 }
 0x8f4   :  { %v437_v38 = vpop.permute.xlu2 %436 }
 0x8f5   :  { %v439_v39 = vmul.f32 %v437_v38, %v422_v16 }
 0x8f7   :  { %486 = vrot.lane.b32.xlu2 %v439_v39, %s1048_s23 }
 0x94a   :  { %v483_v41 = vpop.permute.xlu1 %482 }
 0x94c   :  { %v530_v40 = vpop.permute.xlu0 %529 }
 0x94d   :  { %954 = vmatmul.msk.bf16.vlgmr.msra.gmra.mxu2 %vm157_vm2, %v530_v40 }
 0x94e   :  { %846 = vmatpush.bf16.msra.mxu2 %v1158_v29  ;;  %v113_v29 = vadd.f32 %v1137_v7, %v112_v46 }
 0x951   :  { %v487_v43 = vpop.permute.xlu2 %486 }
 0x952   :  { %v489_v44 = vsel %vm157_vm2, %v483_v41, %v487_v43  ;;  %847 = vmatpush.bf16.msra.mxu2 %v1170_v34 }
 0x953   :  { %v490_v45 = vpack.c.bf16 %v489_v44, %v489_v44 }
 0x955   :  { %953 = vmatmul.msk.bf16.vlgmr.msra.gmra.mxu3 %vm229_vm4, %v490_v45 }
 0x956   :  { %801 = vmatpush.bf16.msra.mxu3 %v1111_v1  ;;  %848 = vmatpush.bf16.msra.mxu2 %v1176_v35 }
 0x95a   :  { %802 = vmatpush.bf16.msra.mxu3 %v1120_v4  ;;  %849 = vmatpush.bf16.msra.mxu2 %v1184_v36 }
 0x9d0   :  { %v543_v47 = vpop.f32.mrf.mxu2 }
 0x9d1   :  { %v547_v48 = vadd.f32 %v543_v47, %v113_v29  ;;  %v965_v47 = vld [vmem:[%s1396_s0 + $0x18] sm:$0xff] }
 0x9d2   :  { %919 = vmatmul.msk.bf16.gmra.mxu0 %vm76_vm1, %v965_v47 }
 0x9d3   :  { %1009 = vtanh.f32 %v547_v48 }
 0x9d8   :  { %v503_v49 = vpop.f32.mrf.mxu3  ;;  %v545_v50 = vpop.f32.mrf.mxu2 }
 0x9d9   :  { %v1010_v34 = vpop.eup %1009  ;;  %v504_v51 = vadd.f32 %v1206_v42, %v503_v49 }
 0x9da   :  { %v549_v52 = vmul.f32 %v1010_v34, %v1140_v15 }
 0x9db   :  { %1011 = vtanh.f32 %v504_v51 }
 0x9dc   :  { %v550_v1 = vadd.f32 %v549_v52, %v1142_v19 }
 0x9de   :  { %553 = vrot.lane.b32.xlu0 %v550_v1, %s1047_s3  ;;  %v551_v58 = vmul.f32 %v550_v1, %v474_v24 }
 0x9e0   :  { %v505_v4 = vpop.f32.mrf.mxu3 }
 0x9e1   :  { %v1012_v35 = vpop.eup %1011 }
 0x9e2   :  { %v508_v36 = vmul.f32 %v1012_v35, %v1140_v15 }
 0x9e4   :  { %v509_v53 = vadd.f32 %v508_v36, %v1142_v19 }
 0x9e6   :  { %512 = vrot.lane.b32.xlu1 %v509_v53, %s1047_s3  ;;  %v510_v62 = vmul.f32 %v509_v53, %v433_v28 }
 0xa50   :  { %v554_v54 = vpop.permute.xlu0 %553 }
 0xa51   :  { %v556_v55 = vmul.f32 %v554_v54, %v550_v1 }
 0xa53   :  { %558 = vrot.lane.b32.xlu2 %v556_v55, %s1048_s23 }
 0xa58   :  { %v513_v56 = vpop.permute.xlu1 %512 }
 0xa59   :  { %v515_v57 = vmul.f32 %v513_v56, %v509_v53 }
 0xa5b   :  { %517 = vrot.lane.b32.xlu0 %v515_v57, %s1048_s23 }
 0xaad   :  { %v559_v59 = vpop.permute.xlu2 %558 }
 0xaae   :  { %v561_v60 = vadd.f32 %v559_v59, %v551_v58 }
 0xab0   :  { %1013 = vtanh.f32 %v561_v60 }
 0xab6   :  { %v1014_v61 = vpop.eup %1013 }
 0xab7   :  { %564 = vrot.lane.b32.xlu1 %v1014_v61, %s1047_s3 }
 0xacd   :  { %v518_v63 = vpop.permute.xlu0 %517 }
 0xace   :  { %v520_v0 = vadd.f32 %v518_v63, %v510_v62 }
 0xad0   :  { %1015 = vtanh.f32 %v520_v0 }
 0xad6   :  { %v1016_v2 = vpop.eup %1015 }
 0xad7   :  { %523 = vrot.lane.b32.xlu2 %v1016_v2, %s1047_s3 }
 0xb29   :  { %v565_v3 = vpop.permute.xlu1 %564 }
 0xb2a   :  { %v567_v5 = vmul.f32 %v565_v3, %v550_v1 }
 0xb2c   :  { %v614_v6 = vpack.c.bf16 %v567_v5, %v567_v5  ;;  %569 = vrot.lane.b32.xlu1 %v567_v5, %s1047_s3 }
 0xb2e   :  { %616 = vrot.lane.b32.xlu0 %v614_v6, %s1047_s3 }
 0xb31   :  { %v524_v8 = vpop.permute.xlu2 %523 }
 0xb32   :  { %v526_v9 = vmul.f32 %v524_v8, %v509_v53  ;;  %v117_v53 = vpop.f32.mrf.mxu0 }
 0xb33   :  { %v118_v55 = vadd.f32 %v1137_v7, %v117_v53 }
 0xb34   :  { %573 = vrot.lane.b32.xlu2 %v526_v9, %s1048_s23 }
 0xb3a   :  { %v119_v54 = vpop.f32.mrf.mxu0 }
 0xb8e   :  { %v574_v10 = vpop.permute.xlu2 %573 }
 0xb9e   :  { %v570_v11 = vpop.permute.xlu1 %569 }
 0xb9f   :  { %v576_v12 = vsel %vm157_vm2, %v570_v11, %v574_v10 }
 0xba0   :  { %v577_v13 = vpack.c.bf16 %v576_v12, %v576_v12  ;;  %v617_v14 = vpop.permute.xlu0 %616 }
 0xba1   :  { %956 = vmatmul.msk.bf16.vlgmr.msrb.gmra.mxu3 %vm157_vm2, %v617_v14 }
 0xba2   :  { %955 = vmatmul.msk.bf16.vlgmr.msrb.gmra.mxu1 %vm229_vm4, %v577_v13 }
 0xc1f   :  { %v590_v16 = vpop.f32.mrf.mxu1 }
 0xc20   :  { %v591_v18 = vadd.f32 %v1206_v42, %v590_v16 }
 0xc22   :  { %1017 = vtanh.f32 %v591_v18 }
 0xc24   :  { %v630_v21 = vpop.f32.mrf.mxu3 }
 0xc25   :  { %v634_v22 = vadd.f32 %v630_v21, %v115_v20 }
 0xc27   :  { %1019 = vtanh.f32 %v634_v22  ;;  %v592_v23 = vpop.f32.mrf.mxu1 }
 0xc28   :  { %v1018_v24 = vpop.eup %1017 }
 0xc29   :  { %v595_v25 = vmul.f32 %v1018_v24, %v1140_v15 }
 0xc2b   :  { %v596_v26 = vadd.f32 %v595_v25, %v1142_v19 }
 0xc2c   :  { %v632_v27 = vpop.f32.mrf.mxu3 }
 0xc2d   :  { %v1020_v28 = vpop.eup %1019  ;;  %599 = vrot.lane.b32.xlu0 %v596_v26, %s1047_s3  ;;  %v597_v39 = vmul.f32 %v596_v26, %v520_v0 }
 0xc2e   :  { %v636_v30 = vmul.f32 %v1020_v28, %v1140_v15 }
 0xc30   :  { %v637_v31 = vadd.f32 %v636_v30, %v1142_v19 }
 0xc32   :  { %640 = vrot.lane.b32.xlu1 %v637_v31, %s1047_s3  ;;  %v638_v44 = vmul.f32 %v637_v31, %v561_v60 }
 0xc9f   :  { %v600_v32 = vpop.permute.xlu0 %599 }
 0xca0   :  { %v602_v33 = vmul.f32 %v600_v32, %v596_v26  ;;  %v120_v32 = vadd.f32 %v1137_v7, %v119_v54 }
 0xca2   :  { %604 = vrot.lane.b32.xlu2 %v602_v33, %s1048_s23 }
 0xca4   :  { %v641_v37 = vpop.permute.xlu1 %640 }
 0xca5   :  { %v643_v38 = vmul.f32 %v641_v37, %v637_v31 }
 0xca7   :  { %645 = vrot.lane.b32.xlu0 %v643_v38, %s1048_s23 }
 0xcfc   :  { %v605_v40 = vpop.permute.xlu2 %604 }
 0xcfd   :  { %v607_v41 = vadd.f32 %v605_v40, %v597_v39 }
 0xcff   :  { %1021 = vtanh.f32 %v607_v41 }
 0xd05   :  { %v1022_v43 = vpop.eup %1021 }
 0xd06   :  { %610 = vrot.lane.b32.xlu1 %v1022_v43, %s1047_s3 }
 0xd19   :  { %v646_v45 = vpop.permute.xlu0 %645 }
 0xd1a   :  { %v648_v46 = vadd.f32 %v646_v45, %v638_v44 }
 0xd1c   :  { %1023 = vtanh.f32 %v648_v46 }
 0xd22   :  { %v1024_v29 = vpop.eup %1023 }
 0xd23   :  { %651 = vrot.lane.b32.xlu2 %v1024_v29, %s1047_s3 }
 0xd78   :  { %v611_v48 = vpop.permute.xlu1 %610 }
 0xd79   :  { %v613_v49 = vmul.f32 %v611_v48, %v596_v26 }
 0xd7b   :  { %660 = vrot.lane.b32.xlu1 %v613_v49, %s1048_s23 }
 0xd7d   :  { %v652_v50 = vpop.permute.xlu2 %651 }
 0xd7e   :  { %v654_v34 = vmul.f32 %v652_v50, %v637_v31 }
 0xd80   :  { %v701_v51 = vpack.c.bf16 %v654_v34, %v654_v34  ;;  %656 = vrot.lane.b32.xlu0 %v654_v34, %s1047_s3 }
 0xd82   :  { %703 = vrot.lane.b32.xlu2 %v701_v51, %s1047_s3 }
 0xddc   :  { %v704_v52 = vpop.permute.xlu2 %703 }
 0xddd   :  { %958 = vmatmul.msk.bf16.vlgmr.msrb.gmra.mxu0 %vm157_vm2, %v704_v52 }
 0xded   :  { %v661_v1 = vpop.permute.xlu1 %660 }
 0xdf2   :  { %v657_v4 = vpop.permute.xlu0 %656 }
 0xdf3   :  { %v663_v35 = vsel %vm157_vm2, %v657_v4, %v661_v1 }
 0xdf4   :  { %v664_v36 = vpack.c.bf16 %v663_v35, %v663_v35 }
 0xdf6   :  { %957 = vmatmul.msk.bf16.vlgmr.msrb.gmra.mxu2 %vm229_vm4, %v664_v36 }
 0xe5a   :  { %v717_v56 = vpop.f32.mrf.mxu0 }
 0xe5b   :  { %v721_v57 = vadd.f32 %v717_v56, %v118_v55 }
 0xe5d   :  { %1025 = vtanh.f32 %v721_v57 }
 0xe62   :  { %v719_v58 = vpop.f32.mrf.mxu0 }
 0xe63   :  { %v1026_v59 = vpop.eup %1025 }
 0xe64   :  { %v723_v60 = vmul.f32 %v1026_v59, %v1140_v15 }
 0xe66   :  { %v724_v61 = vadd.f32 %v723_v60, %v1142_v19 }
 0xe68   :  { %727 = vrot.lane.b32.xlu0 %v724_v61, %s1047_s3  ;;  %v725_v11 = vmul.f32 %v724_v61, %v648_v46 }
 0xe79   :  { %v677_v62 = vpop.f32.mrf.mxu2 }
 0xe7a   :  { %v678_v63 = vadd.f32 %v1206_v42, %v677_v62 }
 0xe7c   :  { %1027 = vtanh.f32 %v678_v63 }
 0xe81   :  { %v679_v0 = vpop.f32.mrf.mxu2 }
 0xe82   :  { %v1028_v2 = vpop.eup %1027 }
 0xe83   :  { %v682_v3 = vmul.f32 %v1028_v2, %v1140_v15 }
 0xe85   :  { %v683_v5 = vadd.f32 %v682_v3, %v1142_v19 }
 0xe87   :  { %686 = vrot.lane.b32.xlu1 %v683_v5, %s1047_s3  ;;  %v684_v16 = vmul.f32 %v683_v5, %v607_v41 }
 0xeda   :  { %v728_v6 = vpop.permute.xlu0 %727 }
 0xedb   :  { %v730_v8 = vmul.f32 %v728_v6, %v724_v61 }
 0xedd   :  { %732 = vrot.lane.b32.xlu2 %v730_v8, %s1048_s23 }
 0xef9   :  { %v687_v9 = vpop.permute.xlu1 %686 }
 0xefa   :  { %v689_v10 = vmul.f32 %v687_v9, %v683_v5  ;;  %v979_v9 = vld [vmem:[%s1402_s8] ss:$0 sm:$0xff] }
 0xefc   :  { %691 = vrot.lane.b32.xlu0 %v689_v10, %s1048_s23 }
 0xf37   :  { %v733_v12 = vpop.permute.xlu2 %732 }
 0xf38   :  { %v735_v13 = vadd.f32 %v733_v12, %v725_v11 }
 0xf3a   :  { %1029 = vtanh.f32 %v735_v13 }
 0xf40   :  { %v1030_v14 = vpop.eup %1029 }
 0xf41   :  { %738 = vrot.lane.b32.xlu1 %v1030_v14, %s1047_s3 }
 0xf6e   :  { %v692_v17 = vpop.permute.xlu0 %691 }
 0xf6f   :  { %v694_v18 = vadd.f32 %v692_v17, %v684_v16  ;;  %v15_v16 = vstv %s1403_s9 }
 0xf70   :  { %16 = vst [vmem:[#allocation2] sm:$0x1] %v15_v16 }
 0xf71   :  { %1031 = vtanh.f32 %v694_v18 }
 0xf77   :  { %v1032_v20 = vpop.eup %1031 }
 0xf78   :  { %697 = vrot.lane.b32.xlu2 %v1032_v20, %s1047_s3  ;;  %v980_v20 = vld [vmem:[#allocation2] ss:$0 sm:$0xff] }
 0xfb3   :  { %v739_v21 = vpop.permute.xlu1 %738 }
 0xfb4   :  { %v741_v22 = vmul.f32 %v739_v21, %v724_v61 }
 0xfb6   :  { %v788_v23 = vpack.c.bf16 %v741_v22, %v741_v22  ;;  %743 = vrot.lane.b32.xlu1 %v741_v22, %s1047_s3 }
 0xfb8   :  { %790 = vrot.lane.b32.xlu0 %v788_v23, %s1047_s3 }
 0xfd2   :  { %v698_v24 = vpop.permute.xlu2 %697 }
 0xfd3   :  { %v700_v25 = vmul.f32 %v698_v24, %v683_v5 }
 0xfd5   :  { %747 = vrot.lane.b32.xlu2 %v700_v25, %s1048_s23 }
0x1028   :  { %v744_v27 = vpop.permute.xlu1 %743 }
0x102a   :  { %v791_v26 = vpop.permute.xlu0 %790 }
0x102b   :  { %960 = vmatmul.msk.bf16.vlgmr.msra.gmra.mxu3 %vm157_vm2, %v791_v26 }
0x102f   :  { %v748_v28 = vpop.permute.xlu2 %747 }
0x1030   :  { %v750_v30 = vsel %vm157_vm2, %v744_v27, %v748_v28 }
0x1031   :  { %v751_v31 = vpack.c.bf16 %v750_v30, %v750_v30 }
0x1033   :  { %959 = vmatmul.msk.bf16.vlgmr.msra.gmra.mxu1 %vm229_vm4, %v751_v31 }
0x10ae   :  { %v804_v33 = vpop.f32.mrf.mxu3 }
0x10af   :  { %v808_v37 = vadd.f32 %v804_v33, %v120_v32 }
0x10b0   :  { %v764_v38 = vpop.f32.mrf.mxu1 }
0x10b1   :  { %1033 = vtanh.f32 %v808_v37  ;;  %v765_v39 = vadd.f32 %v1206_v42, %v764_v38 }
0x10b3   :  { %1035 = vtanh.f32 %v765_v39 }
0x10b6   :  { %v806_v40 = vpop.f32.mrf.mxu3 }
0x10b7   :  { %v1034_v41 = vpop.eup %1033 }
0x10b8   :  { %v810_v43 = vmul.f32 %v1034_v41, %v1140_v15  ;;  %v766_v44 = vpop.f32.mrf.mxu1 }
0x10b9   :  { %v1036_v45 = vpop.eup %1035 }
0x10ba   :  { %v769_v46 = vmul.f32 %v1036_v45, %v1140_v15  ;;  %v811_v29 = vadd.f32 %v810_v43, %v1142_v19 }
0x10bc   :  { %814 = vrot.lane.b32.xlu1 %v811_v29, %s1047_s3  ;;  %v770_v7 = vadd.f32 %v769_v46, %v1142_v19  ;;  %v812_v4 = vmul.f32 %v811_v29, %v735_v13 }
0x10be   :  { %773 = vrot.lane.b32.xlu0 %v770_v7, %s1047_s3  ;;  %v771_v34 = vmul.f32 %v770_v7, %v694_v18 }
0x112e   :  { %v815_v47 = vpop.permute.xlu1 %814 }
0x112f   :  { %v817_v48 = vmul.f32 %v815_v47, %v811_v29 }
0x1130   :  { %v774_v49 = vpop.permute.xlu0 %773 }
0x1131   :  { %v776_v50 = vmul.f32 %v774_v49, %v770_v7  ;;  %819 = vrot.lane.b32.xlu0 %v817_v48, %s1048_s23 }
0x1133   :  { %778 = vrot.lane.b32.xlu2 %v776_v50, %s1048_s23 }
0x118d   :  { %v779_v51 = vpop.permute.xlu2 %778 }
0x118e   :  { %v781_v52 = vadd.f32 %v779_v51, %v771_v34 }
0x1190   :  { %1037 = vtanh.f32 %v781_v52 }
0x1196   :  { %v1038_v1 = vpop.eup %1037 }
0x1197   :  { %784 = vrot.lane.b32.xlu1 %v1038_v1, %s1047_s3 }
0x11a3   :  { %v820_v35 = vpop.permute.xlu0 %819 }
0x11a4   :  { %v822_v36 = vadd.f32 %v820_v35, %v812_v4 }
0x11a6   :  { %1039 = vtanh.f32 %v822_v36 }
0x11ac   :  { %v1040_v53 = vpop.eup %1039 }
0x11ad   :  { %825 = vrot.lane.b32.xlu2 %v1040_v53, %s1047_s3 }
0x1207   :  { %v826_v54 = vpop.permute.xlu2 %825 }
0x1208   :  { %v828_v55 = vmul.f32 %v826_v54, %v811_v29 }
0x1209   :  { %v785_v56 = vpop.permute.xlu1 %784 }
0x120a   :  { %v787_v57 = vmul.f32 %v785_v56, %v770_v7  ;;  %830 = vrot.lane.b32.xlu0 %v828_v55, %s1047_s3 }
0x120c   :  { %834 = vrot.lane.b32.xlu1 %v787_v57, %s1048_s23 }
0x127c   :  { %v831_v58 = vpop.permute.xlu0 %830 }
0x127e   :  { %v835_v59 = vpop.permute.xlu1 %834 }
0x127f   :  { %v837_v60 = vsel %vm157_vm2, %v831_v58, %v835_v59 }
0x1280   :  { %v838_v61 = vpack.c.bf16 %v837_v60, %v837_v60 }
0x1282   :  { %961 = vmatmul.msk.bf16.vlgmr.msra.gmra.mxu2 %vm229_vm4, %v838_v61 }
0x1305   :  { %v851_v62 = vpop.f32.mrf.mxu2 }
0x1306   :  { %v852_v63 = vadd.f32 %v1206_v42, %v851_v62 }
0x1308   :  { %1041 = vtanh.f32 %v852_v63 }
0x130d   :  { %v853_v0 = vpop.f32.mrf.mxu2 }
0x130e   :  { %v1042_v2 = vpop.eup %1041 }
0x130f   :  { %v856_v3 = vmul.f32 %v1042_v2, %v1140_v15 }
0x1311   :  { %v857_v5 = vadd.f32 %v856_v3, %v1142_v19 }
0x1313   :  { %860 = vrot.lane.b32.xlu2 %v857_v5, %s1047_s3  ;;  %v858_v42 = vmul.f32 %v857_v5, %v781_v52 }
0x131b   :  { %878 = vrot.lane.b32.xlu2 %v979_v9, %s1047_s3 }
0x136d   :  { %v861_v6 = vpop.permute.xlu2 %860 }
0x136e   :  { %v863_v8 = vmul.f32 %v861_v6, %v857_v5 }
0x1370   :  { %865 = vrot.lane.b32.xlu0 %v863_v8, %s1048_s23 }
0x1375   :  { %v879_v19 = vpop.permute.xlu2 %878 }
0x13e2   :  { %v866_v10 = vpop.permute.xlu0 %865 }
0x13e3   :  { %v868_v11 = vadd.f32 %v866_v10, %v858_v42 }
0x13e5   :  { %1043 = vtanh.f32 %v868_v11 }
0x13eb   :  { %v1044_v12 = vpop.eup %1043 }
0x13ec   :  { %871 = vrot.lane.b32.xlu1 %v1044_v12, %s1047_s3 }
0x145e   :  { %v872_v15 = vpop.permute.xlu1 %871 }
0x145f   :  { %v874_v13 = vmul.f32 %v872_v15, %v857_v5 }
0x1461   :  { %v881_v14 = vmul.f32 %v879_v19, %v874_v13 }
0x1463   :  { %883 = vrot.lane.b32.xlu0 %v881_v14, %s1047_s3 }
0x14d5   :  { %v884_v17 = vpop.permute.xlu0 %883 }
0x14d6   :  { %v886_v18 = vsel %vm157_vm2, %v884_v17, 0.0 }
0x14d7   :  { %887 = vadd.xlane.f32.xlu1 %v886_v18 }
0x154a   :  { %v888_v21 = vpop.xlane.xlu1 %887 }
0x154b   :  { %v893_v22 = vadd.f32 %v980_v20, %v888_v21 }
0x154d   :  { %895 = vst.msk [vmem:[%s1404_s10] sm:$0xff] %vm894_vm5, %v893_v22 }

</bundles_post_ra>
